<compile_context>
chip_gen: v7x
topology: tpu7x:2x2x1
jax: 0.10.0
libtpu: 0.0.40
codegen_flags: <defaults>
</compile_context>

<pallas_src>
import functools

import jax
import jax.numpy as jnp
from jax.experimental import pallas as pl
from jax.experimental.pallas import tpu as pltpu


# ----------------------------------------------------------------------------
# Kernel: one batch element per grid step.
#   x_ref  : (C, HW)       input (channels, flattened spatial)
#   w1_ref : (Cr, C)       channel-attention MLP layer 1 (PyTorch conv layout)
#   w2_ref : (C, Cr)       channel-attention MLP layer 2
#   wt_ref : (2*K*K, HW)   per-tap conv weights with boundary masks folded in;
#                          rows (2t, 2t+1) = (mean-channel, max-channel), tap t
#   o_ref  : (C, HW)       output
# ----------------------------------------------------------------------------
def _attention_res_block_kernel(x_ref, w1_ref, w2_ref, wt_ref, o_ref, *,
                                ksize, width):
    x = x_ref[...].astype(jnp.float32)                      # (C, HW)
    c, hw = x.shape

    # ---- Channel attention (fused avg/max MLP) -----------------------------
    avg = jnp.mean(x, axis=1, keepdims=True)                 # (C, 1) lane reduce
    mx = jnp.max(x, axis=1, keepdims=True)                   # (C, 1)
    lane = jax.lax.broadcasted_iota(jnp.int32, (c, 2), 1)
    pools = jnp.where(lane == 0, avg, mx)                    # (C, 2) = [avg|max]
    h = jnp.maximum(
        jnp.dot(w1_ref[...].astype(jnp.float32), pools,
                preferred_element_type=jnp.float32), 0.0)    # (Cr, 2)
    z = jnp.dot(w2_ref[...].astype(jnp.float32), h,
                preferred_element_type=jnp.float32)          # (C, 2)
    ca = jax.nn.sigmoid(jnp.sum(z, axis=1, keepdims=True))   # (C, 1)
    x1 = x * ca                                              # (C, HW)

    # ---- Spatial attention --------------------------------------------------
    mean_c = jnp.mean(x1, axis=0, keepdims=True)             # (1, HW)
    max_c = jnp.max(x1, axis=0, keepdims=True)               # (1, HW)
    sub = jax.lax.broadcasted_iota(jnp.int32, (2, hw), 0)
    st = jnp.where(sub == 0, mean_c, max_c)                  # (2, HW)

    # K x K conv as K*K shifted MACs.  Shifts run on the XLU (pltpu.roll);
    # zero-padding boundary masks are already folded into wt_ref.
    pad = ksize // 2
    acc = jnp.zeros((2, hw), jnp.float32)
    for i in range(ksize):
        for j in range(ksize):
            off = (i - pad) * width + (j - pad)              # flat source offset
            t = i * ksize + j
            shifted = st if off == 0 else pltpu.roll(st, (-off) % hw, axis=1)
            acc = acc + shifted * wt_ref[2 * t:2 * t + 2, :].astype(jnp.float32)
    s = jnp.sum(acc, axis=0, keepdims=True)                  # (1, HW)
    sa = jax.nn.sigmoid(s)

    x2 = x1 * sa                                             # (C, HW)

    # ---- Residual ------------------------------------------------------------
    o_ref[...] = (x + x2).astype(o_ref.dtype)


# ----------------------------------------------------------------------------
# Wrapper: NCHW in, NCHW out.
#   w1: (Cr, C), w2: (C, Cr)  -- 1x1-conv weights of the shared MLP (no bias)
#   k_sa: (1, 2, K, K)        -- SpatialAttention conv weight (no bias)
# ----------------------------------------------------------------------------
def attention_res_block(x_nchw, w1, w2, k_sa):
    B, C, H, W = x_nchw.shape
    HW = H * W
    Cr = w1.shape[0]
    K = k_sa.shape[-1]
    pad = K // 2

    # Flattened-spatial view; layout-preserving (no transpose).
    x = x_nchw.reshape(B, C, HW)

    # Fold SAME-zero-padding boundary masks into the per-tap conv weights:
    #   wt[2*t + r, p] = k[r, i, j] * valid_{i,j}(p),  t = i*K + j
    rows = jnp.arange(HW, dtype=jnp.int32) // W
    cols = jnp.arange(HW, dtype=jnp.int32) % W
    d = jnp.arange(K, dtype=jnp.int32) - pad
    row_ok = ((rows[None, :] + d[:, None]) >= 0) & ((rows[None, :] + d[:, None]) < H)
    col_ok = ((cols[None, :] + d[:, None]) >= 0) & ((cols[None, :] + d[:, None]) < W)
    valid = (row_ok[:, None, :] & col_ok[None, :, :]).reshape(K * K, HW)
    kflat = k_sa[0].reshape(2, K * K).astype(jnp.float32)          # (2, K*K)
    wt = (kflat.T[:, :, None] * valid.astype(jnp.float32)[:, None, :]
          ).reshape(K * K * 2, HW)                                  # (2*K*K, HW)

    kernel = functools.partial(_attention_res_block_kernel, ksize=K, width=W)

    out = pl.pallas_call(
        kernel,
        out_shape=jax.ShapeDtypeStruct((B, C, HW), x.dtype),
        grid_spec=pltpu.PrefetchScalarGridSpec(
            num_scalar_prefetch=0,
            grid=(B,),
            in_specs=[
                pl.BlockSpec((pl.Squeezed(), C, HW), lambda b: (b, 0, 0)),
                pl.BlockSpec((Cr, C), lambda b: (0, 0)),
                pl.BlockSpec((C, Cr), lambda b: (0, 0)),
                pl.BlockSpec((2 * K * K, HW), lambda b: (0, 0)),
            ],
            out_specs=pl.BlockSpec((pl.Squeezed(), C, HW), lambda b: (b, 0, 0)),
        ),
        compiler_params=pltpu.CompilerParams(
            dimension_semantics=("parallel",)),
    )(x, w1, w2, wt)

    return out.reshape(B, C, H, W)


# ----------------------------------------------------------------------------
# Pure-JAX reference (mirrors the PyTorch forward) for correctness checking.
# ----------------------------------------------------------------------------
def ref_attention_res_block(x_nchw, w1, w2, k_sa):
    avg = x_nchw.mean(axis=(2, 3))                           # (B, C)
    mx = x_nchw.max(axis=(2, 3))                             # (B, C)
    a = jnp.maximum(avg @ w1.T, 0.0) @ w2.T
    m = jnp.maximum(mx @ w1.T, 0.0) @ w2.T
    ca = jax.nn.sigmoid(a + m)[:, :, None, None]             # (B, C, 1, 1)
    x1 = x_nchw * ca

    mean_c = x1.mean(axis=1, keepdims=True)                  # (B, 1, H, W)
    max_c = x1.max(axis=1, keepdims=True)                    # (B, 1, H, W)
    inp = jnp.concatenate([mean_c, max_c], axis=1)           # (B, 2, H, W)
    s = jax.lax.conv_general_dilated(
        inp, k_sa, window_strides=(1, 1), padding="SAME",
        dimension_numbers=("NCHW", "OIHW", "NCHW"))
    sa = jax.nn.sigmoid(s)                                   # (B, 1, H, W)
    return x_nchw + x1 * sa


if __name__ == "__main__":
    # Shapes consistent with the module: channel=32, c_reduction=16, s_ksize=7,
    # batch=2, spatial 16x16.
    B, C, H, W = 2, 32, 16, 16
    c_reduction = 16
    Cr = C // c_reduction
    s_ksize = 7

    key = jax.random.PRNGKey(0)
    kx, kk1, kk2, kk3 = jax.random.split(key, 4)

    x = jax.random.normal(kx, (B, C, H, W), dtype=jnp.float32)
    # ChannelAttention shared MLP: 1x1 convs (Cr, C) and (C, Cr), no bias.
    w1 = jax.random.normal(kk1, (Cr, C), dtype=jnp.float32) * 0.1
    w2 = jax.random.normal(kk2, (C, Cr), dtype=jnp.float32) * 0.1
    # SpatialAttention conv: Conv2d(2, 1, 7, padding=3, bias=False).
    k_sa = jax.random.normal(kk3, (1, 2, s_ksize, s_ksize), dtype=jnp.float32) * 0.1

    out = attention_res_block(x, w1, w2, k_sa)
    out = jax.block_until_ready(out)

    ref = ref_attention_res_block(x, w1, w2, k_sa)
    assert out.shape == (B, C, H, W)
    err = float(jnp.max(jnp.abs(out - ref)))
    assert jnp.allclose(out, ref, atol=1e-3, rtol=1e-3), err

    print("KERNEL_OK")
</pallas_src>

<mosaic_0001>
module attributes {stable_mosaic.version = 11 : i64} {
  func.func @_attention_res_block_kernel(%arg0: i32, %arg1: memref<1x32x256xf32, #tpu.memory_space<vmem>>, %arg2: memref<2x32xf32, #tpu.memory_space<vmem>>, %arg3: memref<32x2xf32, #tpu.memory_space<vmem>>, %arg4: memref<98x256xf32, #tpu.memory_space<vmem>>, %arg5: memref<1x32x256xf32, #tpu.memory_space<vmem>>) attributes {dimension_semantics = [#tpu.dimension_semantics<parallel>], iteration_bounds = array<i64: 2>, scalar_prefetch = 0 : i64, scratch_operands = 0 : i64, tpu.core_type = #tpu.core_type<tc>, window_params = [{transform_indices = @transform_0, window_bounds = array<i64: 1, 32, 256>}, {pipeline_mode = #tpu.pipeline_mode<synchronous>, transform_indices = @transform_1, window_bounds = array<i64: 2, 32>}, {pipeline_mode = #tpu.pipeline_mode<synchronous>, transform_indices = @transform_2, window_bounds = array<i64: 32, 2>}, {pipeline_mode = #tpu.pipeline_mode<synchronous>, transform_indices = @transform_3, window_bounds = array<i64: 98, 256>}, {transform_indices = @transform_4, window_bounds = array<i64: 1, 32, 256>}]} {
    %c0 = arith.constant 0 : index
    %c0_0 = arith.constant 0 : index
    %c0_1 = arith.constant 0 : index
    %0 = vector.load %arg1[%c0, %c0_0, %c0_1] : memref<1x32x256xf32, #tpu.memory_space<vmem>>, vector<1x32x256xf32>
    %1 = vector.shape_cast %0 : vector<1x32x256xf32> to vector<32x256xf32>
    %cst = arith.constant dense<0.000000e+00> : vector<32xf32>
    %2 = vector.multi_reduction <add>, %1, %cst [1] : vector<32x256xf32> to vector<32xf32>
    %3 = vector.shape_cast %2 : vector<32xf32> to vector<32x1xf32>
    %cst_2 = arith.constant 2.560000e+02 : f32
    %4 = vector.broadcast %cst_2 : f32 to vector<32x1xf32>
    %5 = arith.divf %3, %4 : vector<32x1xf32>
    %cst_3 = arith.constant dense<0xFF800000> : vector<32xf32>
    %6 = vector.multi_reduction <maximumf>, %1, %cst_3 [1] : vector<32x256xf32> to vector<32xf32>
    %7 = vector.shape_cast %6 : vector<32xf32> to vector<32x1xf32>
    %8 = tpu.iota {dimensions = array<i32: 1>} : vector<32x2xi32>
    %c0_i32 = arith.constant 0 : i32
    %9 = vector.broadcast %c0_i32 : i32 to vector<32x2xi32>
    %10 = arith.cmpi eq, %8, %9 : vector<32x2xi32>
    %11 = vector.shape_cast %5 : vector<32x1xf32> to vector<32x1xf32>
    %12 = vector.broadcast %11 : vector<32x1xf32> to vector<32x2xf32>
    %13 = vector.shape_cast %7 : vector<32x1xf32> to vector<32x1xf32>
    %14 = vector.broadcast %13 : vector<32x1xf32> to vector<32x2xf32>
    %15 = arith.select %10, %12, %14 : vector<32x2xi1>, vector<32x2xf32>
    %c0_4 = arith.constant 0 : index
    %c0_5 = arith.constant 0 : index
    %16 = vector.load %arg2[%c0_4, %c0_5] : memref<2x32xf32, #tpu.memory_space<vmem>>, vector<2x32xf32>
    %cst_6 = arith.constant dense<0.000000e+00> : vector<2x2xf32>
    %17 = tpu.matmul %16, %15, %cst_6 {dimension_numbers = #tpu.dot_dimension_numbers<[1], [0], [0], [1], [0, 0, 1, 1], [], []>} : vector<2x32xf32>, vector<32x2xf32>, vector<2x2xf32> -> vector<2x2xf32>
    %cst_7 = arith.constant 0.000000e+00 : f32
    %18 = vector.broadcast %cst_7 : f32 to vector<2x2xf32>
    %19 = arith.maximumf %17, %18 : vector<2x2xf32>
    %c0_8 = arith.constant 0 : index
    %c0_9 = arith.constant 0 : index
    %20 = vector.load %arg3[%c0_8, %c0_9] : memref<32x2xf32, #tpu.memory_space<vmem>>, vector<32x2xf32>
    %cst_10 = arith.constant dense<0.000000e+00> : vector<32x2xf32>
    %21 = tpu.matmul %20, %19, %cst_10 {dimension_numbers = #tpu.dot_dimension_numbers<[1], [0], [0], [1], [0, 0, 1, 1], [], []>} : vector<32x2xf32>, vector<2x2xf32>, vector<32x2xf32> -> vector<32x2xf32>
    %cst_11 = arith.constant dense<0.000000e+00> : vector<32xf32>
    %22 = vector.multi_reduction <add>, %21, %cst_11 [1] : vector<32x2xf32> to vector<32xf32>
    %23 = vector.shape_cast %22 : vector<32xf32> to vector<32x1xf32>
    %24 = arith.negf %23 : vector<32x1xf32>
    %25 = math.exp %24 : vector<32x1xf32>
    %cst_12 = arith.constant 1.000000e+00 : f32
    %26 = vector.broadcast %cst_12 : f32 to vector<32x1xf32>
    %27 = arith.addf %26, %25 : vector<32x1xf32>
    %28 = arith.divf %26, %27 : vector<32x1xf32>
    %29 = vector.broadcast %28 : vector<32x1xf32> to vector<32x256xf32>
    %30 = arith.mulf %1, %29 : vector<32x256xf32>
    %cst_13 = arith.constant dense<0.000000e+00> : vector<256xf32>
    %31 = vector.multi_reduction <add>, %30, %cst_13 [0] : vector<32x256xf32> to vector<256xf32>
    %32 = vector.shape_cast %31 : vector<256xf32> to vector<1x256xf32>
    %cst_14 = arith.constant 3.200000e+01 : f32
    %33 = vector.broadcast %cst_14 : f32 to vector<1x256xf32>
    %34 = arith.divf %32, %33 : vector<1x256xf32>
    %cst_15 = arith.constant dense<0xFF800000> : vector<256xf32>
    %35 = vector.multi_reduction <maximumf>, %30, %cst_15 [0] : vector<32x256xf32> to vector<256xf32>
    %36 = vector.shape_cast %35 : vector<256xf32> to vector<1x256xf32>
    %37 = tpu.iota {dimensions = array<i32: 0>} : vector<2x256xi32>
    %c0_i32_16 = arith.constant 0 : i32
    %38 = vector.broadcast %c0_i32_16 : i32 to vector<2x256xi32>
    %39 = arith.cmpi eq, %37, %38 : vector<2x256xi32>
    %40 = vector.shape_cast %34 : vector<1x256xf32> to vector<1x256xf32>
    %41 = vector.broadcast %40 : vector<1x256xf32> to vector<2x256xf32>
    %42 = vector.shape_cast %36 : vector<1x256xf32> to vector<1x256xf32>
    %43 = vector.broadcast %42 : vector<1x256xf32> to vector<2x256xf32>
    %44 = arith.select %39, %41, %43 : vector<2x256xi1>, vector<2x256xf32>
    %cst_17 = arith.constant 0.000000e+00 : f32
    %45 = vector.broadcast %cst_17 : f32 to vector<2x256xf32>
    %c51_i32 = arith.constant 51 : i32
    %46 = tpu.dynamic_rotate %44 by %c51_i32 dim 1 : vector<2x256xf32>, i32 -> vector<2x256xf32>
    %c0_18 = arith.constant 0 : index
    %c0_19 = arith.constant 0 : index
    %47 = vector.load %arg4[%c0_18, %c0_19] : memref<98x256xf32, #tpu.memory_space<vmem>>, vector<2x256xf32>
    %48 = arith.mulf %46, %47 : vector<2x256xf32>
    %49 = arith.addf %45, %48 : vector<2x256xf32>
    %c50_i32 = arith.constant 50 : i32
    %50 = tpu.dynamic_rotate %44 by %c50_i32 dim 1 : vector<2x256xf32>, i32 -> vector<2x256xf32>
    %c2 = arith.constant 2 : index
    %c0_20 = arith.constant 0 : index
    %51 = vector.load %arg4[%c2, %c0_20] : memref<98x256xf32, #tpu.memory_space<vmem>>, vector<2x256xf32>
    %52 = arith.mulf %50, %51 : vector<2x256xf32>
    %53 = arith.addf %49, %52 : vector<2x256xf32>
    %c49_i32 = arith.constant 49 : i32
    %54 = tpu.dynamic_rotate %44 by %c49_i32 dim 1 : vector<2x256xf32>, i32 -> vector<2x256xf32>
    %c4 = arith.constant 4 : index
    %c0_21 = arith.constant 0 : index
    %55 = vector.load %arg4[%c4, %c0_21] : memref<98x256xf32, #tpu.memory_space<vmem>>, vector<2x256xf32>
    %56 = arith.mulf %54, %55 : vector<2x256xf32>
    %57 = arith.addf %53, %56 : vector<2x256xf32>
    %c48_i32 = arith.constant 48 : i32
    %58 = tpu.dynamic_rotate %44 by %c48_i32 dim 1 : vector<2x256xf32>, i32 -> vector<2x256xf32>
    %c6 = arith.constant 6 : index
    %c0_22 = arith.constant 0 : index
    %59 = vector.load %arg4[%c6, %c0_22] : memref<98x256xf32, #tpu.memory_space<vmem>>, vector<2x256xf32>
    %60 = arith.mulf %58, %59 : vector<2x256xf32>
    %61 = arith.addf %57, %60 : vector<2x256xf32>
    %c47_i32 = arith.constant 47 : i32
    %62 = tpu.dynamic_rotate %44 by %c47_i32 dim 1 : vector<2x256xf32>, i32 -> vector<2x256xf32>
    %c8 = arith.constant 8 : index
    %c0_23 = arith.constant 0 : index
    %63 = vector.load %arg4[%c8, %c0_23] : memref<98x256xf32, #tpu.memory_space<vmem>>, vector<2x256xf32>
    %64 = arith.mulf %62, %63 : vector<2x256xf32>
    %65 = arith.addf %61, %64 : vector<2x256xf32>
    %c46_i32 = arith.constant 46 : i32
    %66 = tpu.dynamic_rotate %44 by %c46_i32 dim 1 : vector<2x256xf32>, i32 -> vector<2x256xf32>
    %c10 = arith.constant 10 : index
    %c0_24 = arith.constant 0 : index
    %67 = vector.load %arg4[%c10, %c0_24] : memref<98x256xf32, #tpu.memory_space<vmem>>, vector<2x256xf32>
    %68 = arith.mulf %66, %67 : vector<2x256xf32>
    %69 = arith.addf %65, %68 : vector<2x256xf32>
    %c45_i32 = arith.constant 45 : i32
    %70 = tpu.dynamic_rotate %44 by %c45_i32 dim 1 : vector<2x256xf32>, i32 -> vector<2x256xf32>
    %c12 = arith.constant 12 : index
    %c0_25 = arith.constant 0 : index
    %71 = vector.load %arg4[%c12, %c0_25] : memref<98x256xf32, #tpu.memory_space<vmem>>, vector<2x256xf32>
    %72 = arith.mulf %70, %71 : vector<2x256xf32>
    %73 = arith.addf %69, %72 : vector<2x256xf32>
    %c35_i32 = arith.constant 35 : i32
    %74 = tpu.dynamic_rotate %44 by %c35_i32 dim 1 : vector<2x256xf32>, i32 -> vector<2x256xf32>
    %c14 = arith.constant 14 : index
    %c0_26 = arith.constant 0 : index
    %75 = vector.load %arg4[%c14, %c0_26] : memref<98x256xf32, #tpu.memory_space<vmem>>, vector<2x256xf32>
    %76 = arith.mulf %74, %75 : vector<2x256xf32>
    %77 = arith.addf %73, %76 : vector<2x256xf32>
    %c34_i32 = arith.constant 34 : i32
    %78 = tpu.dynamic_rotate %44 by %c34_i32 dim 1 : vector<2x256xf32>, i32 -> vector<2x256xf32>
    %c16 = arith.constant 16 : index
    %c0_27 = arith.constant 0 : index
    %79 = vector.load %arg4[%c16, %c0_27] : memref<98x256xf32, #tpu.memory_space<vmem>>, vector<2x256xf32>
    %80 = arith.mulf %78, %79 : vector<2x256xf32>
    %81 = arith.addf %77, %80 : vector<2x256xf32>
    %c33_i32 = arith.constant 33 : i32
    %82 = tpu.dynamic_rotate %44 by %c33_i32 dim 1 : vector<2x256xf32>, i32 -> vector<2x256xf32>
    %c18 = arith.constant 18 : index
    %c0_28 = arith.constant 0 : index
    %83 = vector.load %arg4[%c18, %c0_28] : memref<98x256xf32, #tpu.memory_space<vmem>>, vector<2x256xf32>
    %84 = arith.mulf %82, %83 : vector<2x256xf32>
    %85 = arith.addf %81, %84 : vector<2x256xf32>
    %c32_i32 = arith.constant 32 : i32
    %86 = tpu.dynamic_rotate %44 by %c32_i32 dim 1 : vector<2x256xf32>, i32 -> vector<2x256xf32>
    %c20 = arith.constant 20 : index
    %c0_29 = arith.constant 0 : index
    %87 = vector.load %arg4[%c20, %c0_29] : memref<98x256xf32, #tpu.memory_space<vmem>>, vector<2x256xf32>
    %88 = arith.mulf %86, %87 : vector<2x256xf32>
    %89 = arith.addf %85, %88 : vector<2x256xf32>
    %c31_i32 = arith.constant 31 : i32
    %90 = tpu.dynamic_rotate %44 by %c31_i32 dim 1 : vector<2x256xf32>, i32 -> vector<2x256xf32>
    %c22 = arith.constant 22 : index
    %c0_30 = arith.constant 0 : index
    %91 = vector.load %arg4[%c22, %c0_30] : memref<98x256xf32, #tpu.memory_space<vmem>>, vector<2x256xf32>
    %92 = arith.mulf %90, %91 : vector<2x256xf32>
    %93 = arith.addf %89, %92 : vector<2x256xf32>
    %c30_i32 = arith.constant 30 : i32
    %94 = tpu.dynamic_rotate %44 by %c30_i32 dim 1 : vector<2x256xf32>, i32 -> vector<2x256xf32>
    %c24 = arith.constant 24 : index
    %c0_31 = arith.constant 0 : index
    %95 = vector.load %arg4[%c24, %c0_31] : memref<98x256xf32, #tpu.memory_space<vmem>>, vector<2x256xf32>
    %96 = arith.mulf %94, %95 : vector<2x256xf32>
    %97 = arith.addf %93, %96 : vector<2x256xf32>
    %c29_i32 = arith.constant 29 : i32
    %98 = tpu.dynamic_rotate %44 by %c29_i32 dim 1 : vector<2x256xf32>, i32 -> vector<2x256xf32>
    %c26 = arith.constant 26 : index
    %c0_32 = arith.constant 0 : index
    %99 = vector.load %arg4[%c26, %c0_32] : memref<98x256xf32, #tpu.memory_space<vmem>>, vector<2x256xf32>
    %100 = arith.mulf %98, %99 : vector<2x256xf32>
    %101 = arith.addf %97, %100 : vector<2x256xf32>
    %c19_i32 = arith.constant 19 : i32
    %102 = tpu.dynamic_rotate %44 by %c19_i32 dim 1 : vector<2x256xf32>, i32 -> vector<2x256xf32>
    %c28 = arith.constant 28 : index
    %c0_33 = arith.constant 0 : index
    %103 = vector.load %arg4[%c28, %c0_33] : memref<98x256xf32, #tpu.memory_space<vmem>>, vector<2x256xf32>
    %104 = arith.mulf %102, %103 : vector<2x256xf32>
    %105 = arith.addf %101, %104 : vector<2x256xf32>
    %c18_i32 = arith.constant 18 : i32
    %106 = tpu.dynamic_rotate %44 by %c18_i32 dim 1 : vector<2x256xf32>, i32 -> vector<2x256xf32>
    %c30 = arith.constant 30 : index
    %c0_34 = arith.constant 0 : index
    %107 = vector.load %arg4[%c30, %c0_34] : memref<98x256xf32, #tpu.memory_space<vmem>>, vector<2x256xf32>
    %108 = arith.mulf %106, %107 : vector<2x256xf32>
    %109 = arith.addf %105, %108 : vector<2x256xf32>
    %c17_i32 = arith.constant 17 : i32
    %110 = tpu.dynamic_rotate %44 by %c17_i32 dim 1 : vector<2x256xf32>, i32 -> vector<2x256xf32>
    %c32 = arith.constant 32 : index
    %c0_35 = arith.constant 0 : index
    %111 = vector.load %arg4[%c32, %c0_35] : memref<98x256xf32, #tpu.memory_space<vmem>>, vector<2x256xf32>
    %112 = arith.mulf %110, %111 : vector<2x256xf32>
    %113 = arith.addf %109, %112 : vector<2x256xf32>
    %c16_i32 = arith.constant 16 : i32
    %114 = tpu.dynamic_rotate %44 by %c16_i32 dim 1 : vector<2x256xf32>, i32 -> vector<2x256xf32>
    %c34 = arith.constant 34 : index
    %c0_36 = arith.constant 0 : index
    %115 = vector.load %arg4[%c34, %c0_36] : memref<98x256xf32, #tpu.memory_space<vmem>>, vector<2x256xf32>
    %116 = arith.mulf %114, %115 : vector<2x256xf32>
    %117 = arith.addf %113, %116 : vector<2x256xf32>
    %c15_i32 = arith.constant 15 : i32
    %118 = tpu.dynamic_rotate %44 by %c15_i32 dim 1 : vector<2x256xf32>, i32 -> vector<2x256xf32>
    %c36 = arith.constant 36 : index
    %c0_37 = arith.constant 0 : index
    %119 = vector.load %arg4[%c36, %c0_37] : memref<98x256xf32, #tpu.memory_space<vmem>>, vector<2x256xf32>
    %120 = arith.mulf %118, %119 : vector<2x256xf32>
    %121 = arith.addf %117, %120 : vector<2x256xf32>
    %c14_i32 = arith.constant 14 : i32
    %122 = tpu.dynamic_rotate %44 by %c14_i32 dim 1 : vector<2x256xf32>, i32 -> vector<2x256xf32>
    %c38 = arith.constant 38 : index
    %c0_38 = arith.constant 0 : index
    %123 = vector.load %arg4[%c38, %c0_38] : memref<98x256xf32, #tpu.memory_space<vmem>>, vector<2x256xf32>
    %124 = arith.mulf %122, %123 : vector<2x256xf32>
    %125 = arith.addf %121, %124 : vector<2x256xf32>
    %c13_i32 = arith.constant 13 : i32
    %126 = tpu.dynamic_rotate %44 by %c13_i32 dim 1 : vector<2x256xf32>, i32 -> vector<2x256xf32>
    %c40 = arith.constant 40 : index
    %c0_39 = arith.constant 0 : index
    %127 = vector.load %arg4[%c40, %c0_39] : memref<98x256xf32, #tpu.memory_space<vmem>>, vector<2x256xf32>
    %128 = arith.mulf %126, %127 : vector<2x256xf32>
    %129 = arith.addf %125, %128 : vector<2x256xf32>
    %c3_i32 = arith.constant 3 : i32
    %130 = tpu.dynamic_rotate %44 by %c3_i32 dim 1 : vector<2x256xf32>, i32 -> vector<2x256xf32>
    %c42 = arith.constant 42 : index
    %c0_40 = arith.constant 0 : index
    %131 = vector.load %arg4[%c42, %c0_40] : memref<98x256xf32, #tpu.memory_space<vmem>>, vector<2x256xf32>
    %132 = arith.mulf %130, %131 : vector<2x256xf32>
    %133 = arith.addf %129, %132 : vector<2x256xf32>
    %c2_i32 = arith.constant 2 : i32
    %134 = tpu.dynamic_rotate %44 by %c2_i32 dim 1 : vector<2x256xf32>, i32 -> vector<2x256xf32>
    %c44 = arith.constant 44 : index
    %c0_41 = arith.constant 0 : index
    %135 = vector.load %arg4[%c44, %c0_41] : memref<98x256xf32, #tpu.memory_space<vmem>>, vector<2x256xf32>
    %136 = arith.mulf %134, %135 : vector<2x256xf32>
    %137 = arith.addf %133, %136 : vector<2x256xf32>
    %c1_i32 = arith.constant 1 : i32
    %138 = tpu.dynamic_rotate %44 by %c1_i32 dim 1 : vector<2x256xf32>, i32 -> vector<2x256xf32>
    %c46 = arith.constant 46 : index
    %c0_42 = arith.constant 0 : index
    %139 = vector.load %arg4[%c46, %c0_42] : memref<98x256xf32, #tpu.memory_space<vmem>>, vector<2x256xf32>
    %140 = arith.mulf %138, %139 : vector<2x256xf32>
    %141 = arith.addf %137, %140 : vector<2x256xf32>
    %c48 = arith.constant 48 : index
    %c0_43 = arith.constant 0 : index
    %142 = vector.load %arg4[%c48, %c0_43] : memref<98x256xf32, #tpu.memory_space<vmem>>, vector<2x256xf32>
    %143 = arith.mulf %44, %142 : vector<2x256xf32>
    %144 = arith.addf %141, %143 : vector<2x256xf32>
    %c255_i32 = arith.constant 255 : i32
    %145 = tpu.dynamic_rotate %44 by %c255_i32 dim 1 : vector<2x256xf32>, i32 -> vector<2x256xf32>
    %c50 = arith.constant 50 : index
    %c0_44 = arith.constant 0 : index
    %146 = vector.load %arg4[%c50, %c0_44] : memref<98x256xf32, #tpu.memory_space<vmem>>, vector<2x256xf32>
    %147 = arith.mulf %145, %146 : vector<2x256xf32>
    %148 = arith.addf %144, %147 : vector<2x256xf32>
    %c254_i32 = arith.constant 254 : i32
    %149 = tpu.dynamic_rotate %44 by %c254_i32 dim 1 : vector<2x256xf32>, i32 -> vector<2x256xf32>
    %c52 = arith.constant 52 : index
    %c0_45 = arith.constant 0 : index
    %150 = vector.load %arg4[%c52, %c0_45] : memref<98x256xf32, #tpu.memory_space<vmem>>, vector<2x256xf32>
    %151 = arith.mulf %149, %150 : vector<2x256xf32>
    %152 = arith.addf %148, %151 : vector<2x256xf32>
    %c253_i32 = arith.constant 253 : i32
    %153 = tpu.dynamic_rotate %44 by %c253_i32 dim 1 : vector<2x256xf32>, i32 -> vector<2x256xf32>
    %c54 = arith.constant 54 : index
    %c0_46 = arith.constant 0 : index
    %154 = vector.load %arg4[%c54, %c0_46] : memref<98x256xf32, #tpu.memory_space<vmem>>, vector<2x256xf32>
    %155 = arith.mulf %153, %154 : vector<2x256xf32>
    %156 = arith.addf %152, %155 : vector<2x256xf32>
    %c243_i32 = arith.constant 243 : i32
    %157 = tpu.dynamic_rotate %44 by %c243_i32 dim 1 : vector<2x256xf32>, i32 -> vector<2x256xf32>
    %c56 = arith.constant 56 : index
    %c0_47 = arith.constant 0 : index
    %158 = vector.load %arg4[%c56, %c0_47] : memref<98x256xf32, #tpu.memory_space<vmem>>, vector<2x256xf32>
    %159 = arith.mulf %157, %158 : vector<2x256xf32>
    %160 = arith.addf %156, %159 : vector<2x256xf32>
    %c242_i32 = arith.constant 242 : i32
    %161 = tpu.dynamic_rotate %44 by %c242_i32 dim 1 : vector<2x256xf32>, i32 -> vector<2x256xf32>
    %c58 = arith.constant 58 : index
    %c0_48 = arith.constant 0 : index
    %162 = vector.load %arg4[%c58, %c0_48] : memref<98x256xf32, #tpu.memory_space<vmem>>, vector<2x256xf32>
    %163 = arith.mulf %161, %162 : vector<2x256xf32>
    %164 = arith.addf %160, %163 : vector<2x256xf32>
    %c241_i32 = arith.constant 241 : i32
    %165 = tpu.dynamic_rotate %44 by %c241_i32 dim 1 : vector<2x256xf32>, i32 -> vector<2x256xf32>
    %c60 = arith.constant 60 : index
    %c0_49 = arith.constant 0 : index
    %166 = vector.load %arg4[%c60, %c0_49] : memref<98x256xf32, #tpu.memory_space<vmem>>, vector<2x256xf32>
    %167 = arith.mulf %165, %166 : vector<2x256xf32>
    %168 = arith.addf %164, %167 : vector<2x256xf32>
    %c240_i32 = arith.constant 240 : i32
    %169 = tpu.dynamic_rotate %44 by %c240_i32 dim 1 : vector<2x256xf32>, i32 -> vector<2x256xf32>
    %c62 = arith.constant 62 : index
    %c0_50 = arith.constant 0 : index
    %170 = vector.load %arg4[%c62, %c0_50] : memref<98x256xf32, #tpu.memory_space<vmem>>, vector<2x256xf32>
    %171 = arith.mulf %169, %170 : vector<2x256xf32>
    %172 = arith.addf %168, %171 : vector<2x256xf32>
    %c239_i32 = arith.constant 239 : i32
    %173 = tpu.dynamic_rotate %44 by %c239_i32 dim 1 : vector<2x256xf32>, i32 -> vector<2x256xf32>
    %c64 = arith.constant 64 : index
    %c0_51 = arith.constant 0 : index
    %174 = vector.load %arg4[%c64, %c0_51] : memref<98x256xf32, #tpu.memory_space<vmem>>, vector<2x256xf32>
    %175 = arith.mulf %173, %174 : vector<2x256xf32>
    %176 = arith.addf %172, %175 : vector<2x256xf32>
    %c238_i32 = arith.constant 238 : i32
    %177 = tpu.dynamic_rotate %44 by %c238_i32 dim 1 : vector<2x256xf32>, i32 -> vector<2x256xf32>
    %c66 = arith.constant 66 : index
    %c0_52 = arith.constant 0 : index
    %178 = vector.load %arg4[%c66, %c0_52] : memref<98x256xf32, #tpu.memory_space<vmem>>, vector<2x256xf32>
    %179 = arith.mulf %177, %178 : vector<2x256xf32>
    %180 = arith.addf %176, %179 : vector<2x256xf32>
    %c237_i32 = arith.constant 237 : i32
    %181 = tpu.dynamic_rotate %44 by %c237_i32 dim 1 : vector<2x256xf32>, i32 -> vector<2x256xf32>
    %c68 = arith.constant 68 : index
    %c0_53 = arith.constant 0 : index
    %182 = vector.load %arg4[%c68, %c0_53] : memref<98x256xf32, #tpu.memory_space<vmem>>, vector<2x256xf32>
    %183 = arith.mulf %181, %182 : vector<2x256xf32>
    %184 = arith.addf %180, %183 : vector<2x256xf32>
    %c227_i32 = arith.constant 227 : i32
    %185 = tpu.dynamic_rotate %44 by %c227_i32 dim 1 : vector<2x256xf32>, i32 -> vector<2x256xf32>
    %c70 = arith.constant 70 : index
    %c0_54 = arith.constant 0 : index
    %186 = vector.load %arg4[%c70, %c0_54] : memref<98x256xf32, #tpu.memory_space<vmem>>, vector<2x256xf32>
    %187 = arith.mulf %185, %186 : vector<2x256xf32>
    %188 = arith.addf %184, %187 : vector<2x256xf32>
    %c226_i32 = arith.constant 226 : i32
    %189 = tpu.dynamic_rotate %44 by %c226_i32 dim 1 : vector<2x256xf32>, i32 -> vector<2x256xf32>
    %c72 = arith.constant 72 : index
    %c0_55 = arith.constant 0 : index
    %190 = vector.load %arg4[%c72, %c0_55] : memref<98x256xf32, #tpu.memory_space<vmem>>, vector<2x256xf32>
    %191 = arith.mulf %189, %190 : vector<2x256xf32>
    %192 = arith.addf %188, %191 : vector<2x256xf32>
    %c225_i32 = arith.constant 225 : i32
    %193 = tpu.dynamic_rotate %44 by %c225_i32 dim 1 : vector<2x256xf32>, i32 -> vector<2x256xf32>
    %c74 = arith.constant 74 : index
    %c0_56 = arith.constant 0 : index
    %194 = vector.load %arg4[%c74, %c0_56] : memref<98x256xf32, #tpu.memory_space<vmem>>, vector<2x256xf32>
    %195 = arith.mulf %193, %194 : vector<2x256xf32>
    %196 = arith.addf %192, %195 : vector<2x256xf32>
    %c224_i32 = arith.constant 224 : i32
    %197 = tpu.dynamic_rotate %44 by %c224_i32 dim 1 : vector<2x256xf32>, i32 -> vector<2x256xf32>
    %c76 = arith.constant 76 : index
    %c0_57 = arith.constant 0 : index
    %198 = vector.load %arg4[%c76, %c0_57] : memref<98x256xf32, #tpu.memory_space<vmem>>, vector<2x256xf32>
    %199 = arith.mulf %197, %198 : vector<2x256xf32>
    %200 = arith.addf %196, %199 : vector<2x256xf32>
    %c223_i32 = arith.constant 223 : i32
    %201 = tpu.dynamic_rotate %44 by %c223_i32 dim 1 : vector<2x256xf32>, i32 -> vector<2x256xf32>
    %c78 = arith.constant 78 : index
    %c0_58 = arith.constant 0 : index
    %202 = vector.load %arg4[%c78, %c0_58] : memref<98x256xf32, #tpu.memory_space<vmem>>, vector<2x256xf32>
    %203 = arith.mulf %201, %202 : vector<2x256xf32>
    %204 = arith.addf %200, %203 : vector<2x256xf32>
    %c222_i32 = arith.constant 222 : i32
    %205 = tpu.dynamic_rotate %44 by %c222_i32 dim 1 : vector<2x256xf32>, i32 -> vector<2x256xf32>
    %c80 = arith.constant 80 : index
    %c0_59 = arith.constant 0 : index
    %206 = vector.load %arg4[%c80, %c0_59] : memref<98x256xf32, #tpu.memory_space<vmem>>, vector<2x256xf32>
    %207 = arith.mulf %205, %206 : vector<2x256xf32>
    %208 = arith.addf %204, %207 : vector<2x256xf32>
    %c221_i32 = arith.constant 221 : i32
    %209 = tpu.dynamic_rotate %44 by %c221_i32 dim 1 : vector<2x256xf32>, i32 -> vector<2x256xf32>
    %c82 = arith.constant 82 : index
    %c0_60 = arith.constant 0 : index
    %210 = vector.load %arg4[%c82, %c0_60] : memref<98x256xf32, #tpu.memory_space<vmem>>, vector<2x256xf32>
    %211 = arith.mulf %209, %210 : vector<2x256xf32>
    %212 = arith.addf %208, %211 : vector<2x256xf32>
    %c211_i32 = arith.constant 211 : i32
    %213 = tpu.dynamic_rotate %44 by %c211_i32 dim 1 : vector<2x256xf32>, i32 -> vector<2x256xf32>
    %c84 = arith.constant 84 : index
    %c0_61 = arith.constant 0 : index
    %214 = vector.load %arg4[%c84, %c0_61] : memref<98x256xf32, #tpu.memory_space<vmem>>, vector<2x256xf32>
    %215 = arith.mulf %213, %214 : vector<2x256xf32>
    %216 = arith.addf %212, %215 : vector<2x256xf32>
    %c210_i32 = arith.constant 210 : i32
    %217 = tpu.dynamic_rotate %44 by %c210_i32 dim 1 : vector<2x256xf32>, i32 -> vector<2x256xf32>
    %c86 = arith.constant 86 : index
    %c0_62 = arith.constant 0 : index
    %218 = vector.load %arg4[%c86, %c0_62] : memref<98x256xf32, #tpu.memory_space<vmem>>, vector<2x256xf32>
    %219 = arith.mulf %217, %218 : vector<2x256xf32>
    %220 = arith.addf %216, %219 : vector<2x256xf32>
    %c209_i32 = arith.constant 209 : i32
    %221 = tpu.dynamic_rotate %44 by %c209_i32 dim 1 : vector<2x256xf32>, i32 -> vector<2x256xf32>
    %c88 = arith.constant 88 : index
    %c0_63 = arith.constant 0 : index
    %222 = vector.load %arg4[%c88, %c0_63] : memref<98x256xf32, #tpu.memory_space<vmem>>, vector<2x256xf32>
    %223 = arith.mulf %221, %222 : vector<2x256xf32>
    %224 = arith.addf %220, %223 : vector<2x256xf32>
    %c208_i32 = arith.constant 208 : i32
    %225 = tpu.dynamic_rotate %44 by %c208_i32 dim 1 : vector<2x256xf32>, i32 -> vector<2x256xf32>
    %c90 = arith.constant 90 : index
    %c0_64 = arith.constant 0 : index
    %226 = vector.load %arg4[%c90, %c0_64] : memref<98x256xf32, #tpu.memory_space<vmem>>, vector<2x256xf32>
    %227 = arith.mulf %225, %226 : vector<2x256xf32>
    %228 = arith.addf %224, %227 : vector<2x256xf32>
    %c207_i32 = arith.constant 207 : i32
    %229 = tpu.dynamic_rotate %44 by %c207_i32 dim 1 : vector<2x256xf32>, i32 -> vector<2x256xf32>
    %c92 = arith.constant 92 : index
    %c0_65 = arith.constant 0 : index
    %230 = vector.load %arg4[%c92, %c0_65] : memref<98x256xf32, #tpu.memory_space<vmem>>, vector<2x256xf32>
    %231 = arith.mulf %229, %230 : vector<2x256xf32>
    %232 = arith.addf %228, %231 : vector<2x256xf32>
    %c206_i32 = arith.constant 206 : i32
    %233 = tpu.dynamic_rotate %44 by %c206_i32 dim 1 : vector<2x256xf32>, i32 -> vector<2x256xf32>
    %c94 = arith.constant 94 : index
    %c0_66 = arith.constant 0 : index
    %234 = vector.load %arg4[%c94, %c0_66] : memref<98x256xf32, #tpu.memory_space<vmem>>, vector<2x256xf32>
    %235 = arith.mulf %233, %234 : vector<2x256xf32>
    %236 = arith.addf %232, %235 : vector<2x256xf32>
    %c205_i32 = arith.constant 205 : i32
    %237 = tpu.dynamic_rotate %44 by %c205_i32 dim 1 : vector<2x256xf32>, i32 -> vector<2x256xf32>
    %c96 = arith.constant 96 : index
    %c0_67 = arith.constant 0 : index
    %238 = vector.load %arg4[%c96, %c0_67] : memref<98x256xf32, #tpu.memory_space<vmem>>, vector<2x256xf32>
    %239 = arith.mulf %237, %238 : vector<2x256xf32>
    %240 = arith.addf %236, %239 : vector<2x256xf32>
    %cst_68 = arith.constant dense<0.000000e+00> : vector<256xf32>
    %241 = vector.multi_reduction <add>, %240, %cst_68 [0] : vector<2x256xf32> to vector<256xf32>
    %242 = vector.shape_cast %241 : vector<256xf32> to vector<1x256xf32>
    %243 = arith.negf %242 : vector<1x256xf32>
    %244 = math.exp %243 : vector<1x256xf32>
    %cst_69 = arith.constant 1.000000e+00 : f32
    %245 = vector.broadcast %cst_69 : f32 to vector<1x256xf32>
    %246 = arith.addf %245, %244 : vector<1x256xf32>
    %247 = arith.divf %245, %246 : vector<1x256xf32>
    %248 = vector.broadcast %247 : vector<1x256xf32> to vector<32x256xf32>
    %249 = arith.mulf %30, %248 : vector<32x256xf32>
    %250 = arith.addf %1, %249 : vector<32x256xf32>
    %c0_70 = arith.constant 0 : index
    %c0_71 = arith.constant 0 : index
    %c0_72 = arith.constant 0 : index
    %251 = vector.load %arg5[%c0_70, %c0_71, %c0_72] : memref<1x32x256xf32, #tpu.memory_space<vmem>>, vector<1x32x256xf32>
    %252 = vector.shape_cast %251 : vector<1x32x256xf32> to vector<32x256xf32>
    %253 = vector.shape_cast %250 : vector<32x256xf32> to vector<1x32x256xf32>
    tpu.vector_store %arg5[%c0_70, %c0_71, %c0_72], %253 {strides = array<i32>} : memref<1x32x256xf32, #tpu.memory_space<vmem>>, vector<1x32x256xf32>,
    return
  }
  func.func @transform_0(%arg0: i32) -> (i32, i32, i32) {
    %c0_i32 = arith.constant 0 : i32
    %c0_i32_0 = arith.constant 0 : i32
    %c0_i32_1 = arith.constant 0 : i32
    return %arg0, %c0_i32, %c0_i32_0 : i32, i32, i32
  }
  func.func @transform_1(%arg0: i32) -> (i32, i32) {
    %c0_i32 = arith.constant 0 : i32
    %c0_i32_0 = arith.constant 0 : i32
    %c0_i32_1 = arith.constant 0 : i32
    return %c0_i32, %c0_i32_0 : i32, i32
  }
  func.func @transform_2(%arg0: i32) -> (i32, i32) {
    %c0_i32 = arith.constant 0 : i32
    %c0_i32_0 = arith.constant 0 : i32
    %c0_i32_1 = arith.constant 0 : i32
    return %c0_i32, %c0_i32_0 : i32, i32
  }
  func.func @transform_3(%arg0: i32) -> (i32, i32) {
    %c0_i32 = arith.constant 0 : i32
    %c0_i32_0 = arith.constant 0 : i32
    %c0_i32_1 = arith.constant 0 : i32
    return %c0_i32, %c0_i32_0 : i32, i32
  }
  func.func @transform_4(%arg0: i32) -> (i32, i32, i32) {
    %c0_i32 = arith.constant 0 : i32
    %c0_i32_0 = arith.constant 0 : i32
    %c0_i32_1 = arith.constant 0 : i32
    return %arg0, %c0_i32, %c0_i32_0 : i32, i32, i32
  }
}

</mosaic_0001>

<bundles_post_ra>
// kernel: tpu_custom_call.1
= control target key start
LH: loop header
LB: loop body
LE: loop exit
PB: predicated region body
PF: predicated region fallthrough
CT: control target
= control target key end

     0   :  { %9 = vsyncpa [#allocation3], 0  ;;  %s2869_s0 = inlined_call_operand.hbm [shape: f32[2,32,256], index: 0, kind: input, shape index: {}]   ;;  %s2870_s1 = inlined_call_operand.vmem [shape: f32[2,32], index: 1, kind: input, shape index: {}]   ;;  %s2871_s2 = inlined_call_operand.vmem [shape: f32[32,2], index: 2, kind: input, shape index: {}]   ;;  %s2872_s3 = inlined_call_operand.hbm [shape: f32[98,256], index: 3, kind: input, shape index: {}]   ;;  %s2873_s4 = inlined_call_operand.hbm [shape: f32[2,32,256], index: 4, kind: output, shape index: {}]  }
   0x1   :  { %11 = vsyncpa [#allocation3 + $0x1], 0 }
   0x2   :  { %12 = vsyncpa [#allocation6], 0 }
   0x3   :  { %13 = vsyncpa [#allocation4], 0 }
   0x4   :  { %15 = vsyncpa [#allocation4 + $0x1], 0  ;;  %s1958_s15 = smov 0   ;;  %s1960_s16 = smov 0  }
   0x5   :  { %s1962_s17 = smov 0   ;;  %s1964_s18 = smov 0  }
   0x6 LB: > { %s1979_s19 = sadd.s32 4294967295, %s1874_s18   ;;  %s1538_s20 = sadd.s32 4294967294, %s1874_s18   ;;  %s1874_s18 = sphi %s1964_s18, %s2905_s18   ;;  %s1870_s17 = sphi %s1962_s17, %s2904_s17   ;;  %s1866_s16 = sphi %s1960_s16, %s2903_s16   ;;  %s1862_s15 = sphi %s1958_s15, %s2902_s15  }
   0x7   : > { %p41_p0 = scmp.ne.s32.totalorder %s1866_s16, %s1862_s15  ;;  %p2874_p1 = scmp.eq.s32.totalorder %s1979_s19, 0 }
   0x8   : > { %p134_p3 = scmp.eq.s32.totalorder %s1538_s20, 1  ;;  %p1539_p5 = scmp.ge.s32.totalorder %s1874_s18, 1 }
   0x9   : > { %p1988_p4 = por %p2874_p1, %p41_p0  ;;  %p141_p7 = scmp.lt.s32.totalorder %s1874_s18, 3 }
   0xa   : > { %p1993_p6 = por %p134_p3, %p41_p0  ;;  %s1876_s24 = smov [#allocation5]  }
   0xb   : > { %s2881_s21 = scalar_select %p1988_p4, 1, 0 }
   0xc   : > { %s2882_s22 = scalar_select %p1993_p6, 1, 0 }
   0xd   : > { %p1998_p8 = pnand %p1539_p5, %p141_p7  ;;  %s159_s25 = sshll.u32 %s1876_s24, 4  ;;  %s2002_s25 = int_to_ptr.vmem [resolvable:$true] %s159_s25 }
   0xe   : > { %s2014_s27 = sadd.s32 1, %s1874_s18   ;;  %s28_s28 = sadd.s32 1, %s1870_s17 }
   0xf   : > { %s2883_s23 = scalar_select %p1998_p8, 1, 0 }
  0x10   : > { %p1611_p9 = pneg %p1998_p8  ;;  %s25_s29 = ssub.s32 %s1874_s18, %s2014_s27 }
  0x11   : > { %s1746_s6 = scalar_lea.hbm %s2872_s3, 3328 }
  0x12   : > { %p2009_p11 = pnand %p1611_p9, %p2874_p1  ;;  %p1747_p12 = scmp.ne.s32.totalorder %s2872_s3, %s1746_s6 }
  0x13   : > { %p1753_p5 = scmp.lt.u32.totalorder %s1746_s6, %s2872_s3 }
  0x14   : > { %p1748_p13 = pneg %p2009_p11 }
  0x16   : > { %p1749_p0 = pnand %p1748_p13, %p1747_p12 }
  0x18   : > { %p1750_p3 = pneg %p1749_p0 }
  0x1a   : > { %p1755_p7 = pnand %p1753_p5, %p1750_p3 }
  0x1c   : > { %1758 = shalt.err (!%p1755_p7)
}
  0x1d   : > { %s1759_s11 = scalar_lea.vmem %s2002_s25, 3328  ;;  %p1767_p2 = scmp.lt.s32.totalorder %s2002_s25, %s2002_s25 }
  0x1e   : > { %p1760_p9 = scmp.ne.s32.totalorder %s2002_s25, %s1759_s11  ;;  %p1768_p6 = scmp.lt.s32.totalorder %s1759_s11, %s1759_s11 }
  0x20   : > { %p1762_p10 = pnand %p1760_p9, %p1748_p13  ;;  %p1769_p4 = por %p1768_p6, %p1767_p2 }
  0x22   : > { %p1763_p1 = pneg %p1762_p10 }
  0x24   : > { %p1770_p8 = pnand %p1769_p4, %p1763_p1 }
  0x26   : > { %1773 = shalt.err (!%p1770_p8)
}
  0x27   : > { %s1877_s12 = smov 256   ;;  %s1878_s13 = smov 16  }
  0x28   : > { %1614 = dma.hbm_to_vmem [thread:$0]  (!%p2009_p11), %s2872_s3, 3328, %s2002_s25, [#allocation6], %s1877_s12, %s1877_s12, %s1878_s13  }
  0x29   : > { %p26_p1 = scmp.eq.s32.totalorder %s25_s29, 0  ;;  %p35_p2 = scmp.ne.s32.totalorder %s1870_s17, %s1866_s16 }
  0x2a   : > { %p36_p4 = scmp.eq.s32.totalorder %s1874_s18, 0  ;;  %p1624_p6 = scmp.lt.s32.totalorder %s1874_s18, 2 }
  0x2b   : > { %s2048_s24 = scalar_select %p26_p1, %s1870_s17, %s28_s28  }
  0x2c   : > { %p37_p8 = por %p36_p4, %p35_p2  ;;  %p2885_p10 = scmp.eq.s32.totalorder %s1979_s19, 1 }
  0x2d   : > { %s173_s26 = sand.u32 1, %s1870_s17   ;;  %s1566_s5 = sshll.u32 %s1874_s18, 10 }
  0x2e   : > { %p2052_p12 = por %p2885_p10, %p35_p2  ;;  %s1542_s6 = sshll.u32 %s173_s26, 6 }
  0x2f   : > { %s2061_s9 = scalar_lea.hbm %s2869_s0, %s1566_s5  ;;  %s177_s25 = scalar_lea.vmem [#allocation2], %s1542_s6 }
  0x30   : > { %s184_s28 = sshll.u32 %s177_s25, 4  ;;  %p2063_p11 = pnand %p1624_p6, %p37_p8  ;;  %s2067_s28 = int_to_ptr.vmem [resolvable:$true] %s184_s28 }
  0x31   : > { %s2069_s10 = scalar_lea.sflag [#allocation3], %s173_s26  ;;  %s1774_s11 = scalar_lea.hbm %s2061_s9, 1024 }
  0x32   : > { %p1775_p13 = scmp.ne.s32.totalorder %s2061_s9, %s1774_s11  ;;  %p1776_p0 = pneg %p2063_p11 }
  0x33   : > { %s1779_s5 = scalar_lea.hbm %s2869_s0, 2048  ;;  %p1780_p7 = scmp.lt.u32.totalorder %s2061_s9, %s2869_s0 }
  0x34   : > { %p1777_p3 = pnand %p1776_p0, %p1775_p13  ;;  %p1781_p9 = scmp.lt.u32.totalorder %s1779_s5, %s1774_s11 }
  0x35   : > { %p1783_p2 = scmp.lt.u32.totalorder %s1774_s11, %s2061_s9 }
  0x36   : > { %p1778_p5 = pneg %p1777_p3  ;;  %p1782_p1 = por %p1781_p9, %p1780_p7 }
  0x38   : > { %p1784_p4 = por %p1783_p2, %p1782_p1 }
  0x3a   : > { %p1785_p6 = pnand %p1784_p4, %p1778_p5 }
  0x3c   : > { %1788 = shalt.err (!%p1785_p6)
}
  0x3d   : > { %s1789_s26 = scalar_lea.vmem %s2067_s28, 1024  ;;  %s1879_s8 = smov [#allocation2]  }
  0x3e   : > { %p1790_p8 = scmp.ne.s32.totalorder %s2067_s28, %s1789_s26  ;;  %s1794_s25 = sshll.u32 %s1879_s8, 4  ;;  %s1795_s25 = int_to_ptr.vmem [resolvable:$false] %s1794_s25 }
  0x3f   : > { %s1796_s14 = scalar_lea.vmem %s1795_s25, 2048  ;;  %p1797_p3 = scmp.lt.s32.totalorder %s2067_s28, %s1795_s25 }
  0x40   : > { %p1792_p10 = pnand %p1790_p8, %p1776_p0  ;;  %p1798_p7 = scmp.lt.s32.totalorder %s1796_s14, %s1789_s26 }
  0x42   : > { %p1793_p13 = pneg %p1792_p10  ;;  %p1799_p9 = por %p1798_p7, %p1797_p3 }
  0x44   : > { %p1800_p1 = pnand %p1799_p9, %p1793_p13 }
  0x46   : > { %1803 = shalt.err (!%p1800_p1)
}
  0x47   : > { %1618 = dma.hbm_to_vmem [thread:$0]  (!%p2063_p11), %s2061_s9, 1024, %s2067_s28, %s2069_s10, %s1877_s12, %s1877_s12, %s1878_s13  }
  0x48   : > { %p2888_p0 = scmp.ne.s32.totalorder %s2883_s23, 0 }
  0x4a   : > { %196 = sbr.rel (%p2888_p0) target bundleno = 1248 (0x4e0), region = 36 }
  0x51   : > { %s2103_s11 = sand.u32 1, %s1866_s16   ;;  %p2889_p5 = scmp.ne.s32.totalorder %s2881_s21, 0 }
  0x52   : > { %s1546_s20 = sshll.u32 %s2103_s11, 6  ;;  %s199_s5 = scalar_lea.sflag [#allocation3], %s2103_s11 }
  0x53   : > { %s2109_s29 = scalar_lea.vmem [#allocation2], %s1546_s20 }
  0x54   : > { %1849 = dma.done.wait (%p2889_p5), %s199_s5, 1024  }
  0x55   : > { %1851 = vsyncadd (%p2889_p5), %s199_s5, 4294966272  ;;  %p2890_p11 = scmp.eq.s32.totalorder %s1979_s19, 0 }
  0x57   : > { %1853 = dma.done.wait (%p2890_p11), [#allocation6], 3328   ;;  %p2891_p2 = pmov %p2890_p11 }
  0x58   : > { %v2120_v0 = vld [vmem:[%s2109_s29] sm:$0xff]  ;;  %v2123_v1 = vld [vmem:[%s2109_s29 + $0x8] sm:$0xff]  ;;  %v2126_v2 = vld [vmem:[%s2109_s29 + $0x10] sm:$0xff]  ;;  %v1880_v16 = vmov 0.0|0.0   ;;  %vm1881_vm0 = vmmov 0   ;;  %v1882_v17 = vmov 0.0   ;;  %v268_v18 = vlaneseq }
  0x59   : > { %1855 = vsyncadd (%p2891_p2), [#allocation6], 4294963968  ;;  %v256_v3 = vmax.f32 %v2120_v0, %v2123_v1  ;;  %v239_v4 = vadd.f32 %v2123_v1, %v2120_v0  ;;  %v2133_v5 = vld [vmem:[%s2109_s29 + $0x18] sm:$0xff]  ;;  %v2140_v8 = vld [vmem:[%s2109_s29 + $0x30] sm:$0xff]  ;;  %1597 = vmatprep.subr.bf16.mxu0 %v1880_v16  ;;  %1586 = vmatprep.mubr.msk.f32.mxu0 %vm1881_vm0, %v1882_v17  ;;  %vm276_vm2 = vcmask 261120   ;;  %vm355_vm3 = vcmask 15360  }
  0x5a   : > { %v259_v6 = vmax.f32 %v2126_v2, %v2133_v5  ;;  %v242_v7 = vadd.f32 %v2133_v5, %v2126_v2  ;;  %v2143_v9 = vld [vmem:[%s2109_s29 + $0x38] sm:$0xff]  ;;  %v2146_v10 = vld [vmem:[%s2109_s29 + $0x20] sm:$0xff]  ;;  %v2149_v11 = vld [vmem:[%s2109_s29 + $0x28] sm:$0xff]  ;;  %v2160_v21 = vand.u32 127, %v268_v18  ;;  %vm368_vm4 = vcmask 1041408   ;;  %s1883_s8 = smov 51  }
  0x5b   : > { %257 = vmax.xlane.f32.xlu1 %v256_v3  ;;  %240 = vadd.xlane.f32.xlu0 %v239_v4  ;;  %v248_v12 = vadd.f32 %v2143_v9, %v2140_v8  ;;  %v245_v13 = vadd.f32 %v2149_v11, %v2146_v10  ;;  %v265_v14 = vmax.f32 %v2140_v8, %v2143_v9  ;;  %v275_v38 = vld [vmem:[%s2870_s1] sm:$0x3]  ;;  %v352_v43 = vld [vmem:[%s2871_s2 + $0x8] sm:$0xff]  ;;  %v353_v44 = vld [vmem:[%s2871_s2 + $0x10] sm:$0xff]  ;;  %s1884_s25 = smov 50   ;;  %s1885_s14 = smov 49  }
  0x5c   : > { %v262_v15 = vmax.f32 %v2146_v10, %v2149_v11  ;;  %vm270_vm1 = vcmp.eq.s32.totalorder %v2160_v21, 0  ;;  %v351_v39 = vld [vmem:[%s2871_s2] sm:$0xff]  ;;  %v354_v45 = vld [vmem:[%s2871_s2 + $0x18] sm:$0xff]  ;;  %s1886_s5 = smov 48   ;;  %s1887_s21 = smov 47   ;;  %vm549_vm6 = vcmp.lt.s32.totalorder %v2160_v21, 51 }
  0x5d   : > { %1591 = vmatprep.mubr.msk.f32.mxu1 %vm355_vm3, %v351_v39  ;;  %s1888_s23 = smov 46   ;;  %s1889_s12 = smov 45   ;;  %vm562_vm7 = vcmp.lt.s32.totalorder %v2160_v21, 50  ;;  %vm581_vm8 = vcmp.lt.s32.totalorder %v2160_v21, 49  ;;  %vm600_vm9 = vcmp.lt.s32.totalorder %v2160_v21, 48  ;;  %vm619_vm10 = vcmp.lt.s32.totalorder %v2160_v21, 47 }
  0x5e   : > { %s1890_s13 = smov 35   ;;  %s1891_s9 = smov 34   ;;  %vm632_vm11 = vcmp.lt.s32.totalorder %v2160_v21, 46  ;;  %vm651_vm12 = vcmp.lt.s32.totalorder %v2160_v21, 45  ;;  %vm670_vm13 = vcmp.lt.s32.totalorder %v2160_v21, 35  ;;  %vm689_vm14 = vcmp.lt.s32.totalorder %v2160_v21, 34 }
  0x5f   : > { %260 = vmax.xlane.f32.xlu1 %v259_v6  ;;  %243 = vadd.xlane.f32.xlu0 %v242_v7  ;;  %s1892_s28 = smov 33   ;;  %s1893_s10 = smov 32   ;;  %vm702_vm15 = vcmp.lt.s32.totalorder %v2160_v21, 33  ;;  %vm721_vm0 = vcmp.lt.s32.totalorder %v2160_v21, 32 }
  0x60   : > { %s1894_s6 = smov 31   ;;  %s1895_s7 = smov 30  }
  0x61   : > { %s1896_s26 = smov 29  }
  0x63   : > { %249 = vadd.xlane.f32.xlu1 %v248_v12  ;;  %246 = vadd.xlane.f32.xlu0 %v245_v13 }
  0x67   : > { %266 = vmax.xlane.f32.xlu1 %v265_v14  ;;  %263 = vmax.xlane.f32.xlu0 %v262_v15 }
  0xe8   : > { %v258_v19 = vpop.xlane.xlu1 %257  ;;  %v241_v20 = vpop.xlane.xlu0 %240 }
  0xe9   : > { %v252_v22 = vmul.f32 0.00390625, %v241_v20 }
  0xeb   : > { %v271_v26 = vsel %vm270_vm1, %v252_v22, %v258_v19 }
  0xec   : > { %v261_v23 = vpop.xlane.xlu1 %260  ;;  %v244_v24 = vpop.xlane.xlu0 %243 }
  0xed   : > { %v253_v25 = vmul.f32 0.00390625, %v244_v24 }
  0xef   : > { %v272_v27 = vsel %vm270_vm1, %v253_v25, %v261_v23 }
  0xf0   : > { %v250_v28 = vpop.xlane.xlu1 %249  ;;  %v247_v29 = vpop.xlane.xlu0 %246  ;;  %v1598_v30 = vpack.c.bf16 %v272_v27, %v271_v26 }
  0xf1   : > { %v255_v31 = vmul.f32 0.00390625, %v250_v28  ;;  %v254_v32 = vmul.f32 0.00390625, %v247_v29 }
  0xf2   : > { %1599 = vmatpush3.bf16.msra.mxu0 %v1598_v30 }
  0xf3   : > { %1600 = vmatprep.subr.bf16.mxu0 %v1880_v16 }
  0xf4   : > { %v267_v33 = vpop.xlane.xlu1 %266  ;;  %v264_v34 = vpop.xlane.xlu0 %263 }
  0xf5   : > { %v274_v35 = vsel %vm270_vm1, %v255_v31, %v267_v33  ;;  %v273_v36 = vsel %vm270_vm1, %v254_v32, %v264_v34  ;;  %vm740_vm1 = vcmp.lt.s32.totalorder %v2160_v21, 31 }
  0xf6   : > { %v1601_v37 = vpack.c.bf16 %v274_v35, %v273_v36 }
  0xf8   : > { %1602 = vmatpush3.bf16.msra.mxu0 %v1601_v37 }
  0xfb   : > { %1587 = vmatmul.mubr.msk.f32.vlgmr.msra.gmra.mrb[0].mxu0 %vm276_vm2, %v275_v38  ;;  %vm759_vm2 = vcmp.lt.s32.totalorder %v2160_v21, 30 }
 0x1ce   : > { %v346_v40 = vpop.f32.mrb[0].mxu0 }
 0x1cf   : > { %v350_v41 = vmax.f32 %v346_v40, 0.0  ;;  %v1588_v42 = vpop.f32.mrb[1].mxu0 }
 0x1d1   : > { %1589 = vmatprep.subr.msk.mxu1 %vm368_vm4, %v350_v41 }
 0x1d2   : > { %1590 = vmatpush3.msk.msra.mxu1 %vm368_vm4, %v350_v41 }
 0x1d3   : > { %1592 = vmatmul.mubr.msk.f32.vlgmr.msra.gmra.mrb[0].mxu1 %vm355_vm3, %v352_v43 }
 0x1d4   : > { %1594 = vmatprep.mubr.msk.f32.mxu1 %vm355_vm3, %v353_v44 }
 0x1d7   : > { %1595 = vmatmul.mubr.msk.f32.gmra.mrb[2].mxu1 %vm355_vm3, %v354_v45 }
 0x2a6   : > { %v1593_v46 = vpop.f32.mrb[0].mxu1 }
 0x2a7   : > { %v438_v47 = vpop.f32.mrb[1].mxu1  ;;  %v460_v48 = vsel %vm355_vm3, %v1593_v46, 0.0 }
 0x2a8   : > { %461 = vadd.xlane.f32.xlu1 %v460_v48  ;;  %v457_v49 = vsel %vm355_vm3, %v438_v47, 0.0  ;;  %v541_v48 = vshrl.u32 %v268_v18, 7 }
 0x2a9   : > { %458 = vadd.xlane.f32.xlu0 %v457_v49 }
 0x2aa   : > { %v1596_v50 = vpop.f32.mrb[2].mxu1  ;;  %vm542_vm5 = vcmp.eq.s32.totalorder %v541_v48, 0 }
 0x2ab   : > { %v448_v51 = vpop.f32.mrb[3].mxu1  ;;  %v466_v52 = vsel %vm355_vm3, %v1596_v50, 0.0 }
 0x2ac   : > { %467 = vadd.xlane.f32.xlu1 %v466_v52  ;;  %v463_v53 = vsel %vm355_vm3, %v448_v51, 0.0  ;;  %vm772_vm3 = vcmp.lt.s32.totalorder %v2160_v21, 29 }
 0x2ad   : > { %464 = vadd.xlane.f32.xlu0 %v463_v53 }
 0x335   : > { %v462_v54 = vpop.xlane.xlu1 %461 }
 0x336   : > { %v1556_v55 = vmul.f32 -1.442695, %v462_v54  ;;  %v459_v56 = vpop.xlane.xlu0 %458 }
 0x337   : > { %v1555_v57 = vmul.f32 -1.442695, %v459_v56 }
 0x338   : > { %1714 = vpow2.f32 %v1556_v55 }
 0x339   : > { %1716 = vpow2.f32 %v1555_v57  ;;  %v468_v58 = vpop.xlane.xlu1 %467 }
 0x33a   : > { %v1558_v59 = vmul.f32 -1.442695, %v468_v58  ;;  %v465_v60 = vpop.xlane.xlu0 %464 }
 0x33b   : > { %v1557_v61 = vmul.f32 -1.442695, %v465_v60 }
 0x33c   : > { %1718 = vpow2.f32 %v1558_v59 }
 0x33d   : > { %1720 = vpow2.f32 %v1557_v61 }
 0x342   : > { %v1715_v62 = vpop.eup %1714 }
 0x343   : > { %v1717_v63 = vpop.eup %1716  ;;  %v482_v3 = vadd.f32 1.0, %v1715_v62 }
 0x344   : > { %v481_v4 = vadd.f32 1.0, %v1717_v63 }
 0x345   : > { %1722 = vrcp.f32 %v482_v3  ;;  %v565_v3 = vld [vmem:[#allocation5] sm:$0xc] }
 0x346   : > { %v1719_v6 = vpop.eup %1718  ;;  %1724 = vrcp.f32 %v481_v4  ;;  %v566_v4 = vld [vmem:[#allocation5 + $0x8] sm:$0xc] }
 0x347   : > { %v1721_v7 = vpop.eup %1720  ;;  %v484_v12 = vadd.f32 1.0, %v1719_v6 }
 0x348   : > { %v483_v13 = vadd.f32 1.0, %v1721_v7 }
 0x349   : > { %1726 = vrcp.f32 %v484_v12  ;;  %v552_v12 = vld [vmem:[#allocation5] sm:$0x3] }
 0x34a   : > { %1728 = vrcp.f32 %v483_v13  ;;  %v569_v13 = vrot.slane %v565_v3, 2 }
 0x34f   : > { %v1723_v14 = vpop.eup %1722 }
 0x350   : > { %v1725_v15 = vpop.eup %1724  ;;  %v2189_v16 = vmul.f32 %v1723_v14, %v2126_v2  ;;  %v2192_v17 = vmul.f32 %v1723_v14, %v2133_v5  ;;  %v570_v14 = vrot.slane %v566_v4, 2  ;;  %v654_v4 = vld [vmem:[#allocation5 + $0x10] sm:$0x30] }
 0x351   : > { %v2195_v19 = vmul.f32 %v1725_v15, %v2120_v0  ;;  %v2198_v20 = vmul.f32 %v1725_v15, %v2123_v1  ;;  %v584_v15 = vld [vmem:[#allocation5] sm:$0x30] }
 0x352   : > { %2892 = vst [vmem:[#allocation11_spill] sm:$0xff] %v2192_v17 }
 0x353   : > { %2893 = vst [vmem:[#allocation12_spill] sm:$0xff] %v2198_v20  ;;  %v1727_v22 = vpop.eup %1726  ;;  %v501_v2 = vadd.f32 %v2189_v16, %v2195_v19  ;;  %v510_v5 = vadd.f32 %v2192_v17, %v2198_v20 }
 0x354   : > { %v1729_v23 = vpop.eup %1728  ;;  %v2201_v24 = vmul.f32 %v1727_v22, %v2140_v8  ;;  %v2204_v25 = vmul.f32 %v1727_v22, %v2143_v9  ;;  %v553_v22 = vld [vmem:[#allocation5 + $0x8] sm:$0x3] }
 0x355   : > { %v2211_v0 = vmul.f32 %v1729_v23, %v2146_v10  ;;  %v2214_v1 = vmul.f32 %v1729_v23, %v2149_v11  ;;  %v585_v23 = vld [vmem:[#allocation5 + $0x8] sm:$0x30] }
 0x356   : > { %2894 = vst [vmem:[#allocation13_spill] sm:$0xff] %v2204_v25  ;;  %v523_v26 = vmax.f32 %v2189_v16, %v2201_v24  ;;  %v532_v8 = vmax.f32 %v2192_v17, %v2204_v25 }
 0x357   : > { %2895 = vst [vmem:[#allocation14_spill] sm:$0xff] %v2214_v1  ;;  %v502_v9 = vadd.f32 %v501_v2, %v2211_v0  ;;  %v511_v27 = vadd.f32 %v510_v5, %v2214_v1  ;;  %v522_v28 = vmax.f32 %v2195_v19, %v2211_v0  ;;  %v531_v10 = vmax.f32 %v2198_v20, %v2214_v1 }
 0x359   : > { %v503_v29 = vadd.f32 %v502_v9, %v2201_v24  ;;  %v512_v11 = vadd.f32 %v511_v27, %v2204_v25  ;;  %v524_v30 = vmax.f32 %v522_v28, %v523_v26  ;;  %v533_v31 = vmax.f32 %v531_v10, %v532_v8 }
 0x35a   : > { %v588_v27 = vrot.slane %v584_v15, 4 }
 0x35b   : > { %v504_v32 = vrot.slane %v503_v29, 4  ;;  %v513_v33 = vrot.slane %v512_v11, 4  ;;  %v525_v34 = vrot.slane %v524_v30, 4  ;;  %v534_v35 = vrot.slane %v533_v31, 4 }
 0x35d   : > { %v505_v36 = vadd.f32 %v504_v32, %v503_v29  ;;  %v514_v37 = vadd.f32 %v513_v33, %v512_v11  ;;  %v526_v38 = vmax.f32 %v524_v30, %v525_v34  ;;  %v535_v39 = vmax.f32 %v533_v31, %v534_v35  ;;  %v603_v30 = vld [vmem:[#allocation5] sm:$0xc0]  ;;  %v604_v31 = vld [vmem:[#allocation5 + $0x8] sm:$0xc0] }
 0x35e   : > { %v589_v11 = vrot.slane %v585_v23, 4 }
 0x35f   : > { %v506_v40 = vrot.slane %v505_v36, 2  ;;  %v515_v41 = vrot.slane %v514_v37, 2  ;;  %v527_v42 = vrot.slane %v526_v38, 2  ;;  %v536_v43 = vrot.slane %v535_v39, 2 }
 0x361   : > { %v507_v44 = vadd.f32 %v506_v40, %v505_v36  ;;  %v516_v45 = vadd.f32 %v515_v41, %v514_v37  ;;  %v528_v46 = vmax.f32 %v526_v38, %v527_v42  ;;  %v537_v47 = vmax.f32 %v535_v39, %v536_v43 }
 0x362   : > { %v607_v40 = vrot.slane %v603_v30, 6  ;;  %v608_v41 = vrot.slane %v604_v31, 6 }
 0x363   : > { %v508_v49 = vrot.slane %v507_v44, 1  ;;  %v517_v50 = vrot.slane %v516_v45, 1  ;;  %v529_v51 = vrot.slane %v528_v46, 1  ;;  %v538_v52 = vrot.slane %v537_v47, 1 }
 0x365   : > { %v509_v53 = vadd.f32 %v508_v49, %v507_v44  ;;  %v518_v54 = vadd.f32 %v517_v50, %v516_v45  ;;  %v530_v57 = vmax.f32 %v528_v46, %v529_v51  ;;  %v539_v58 = vmax.f32 %v537_v47, %v538_v52  ;;  %v622_v50 = vld [vmem:[#allocation5 + $0x10] sm:$0x3]  ;;  %v623_v51 = vld [vmem:[#allocation5 + $0x18] sm:$0x3]  ;;  %v635_v52 = vld [vmem:[#allocation5 + $0x10] sm:$0xc] }
 0x367   : > { %v520_v55 = vmul.f32 0.03125, %v509_v53  ;;  %v521_v56 = vmul.f32 0.03125, %v518_v54  ;;  %v636_v53 = vld [vmem:[#allocation5 + $0x18] sm:$0xc] }
 0x368   : > { %v640_v3 = vrot.slane %v636_v53, 2 }
 0x369   : > { %v2229_v59 = vsel %vm542_vm5, %v520_v55, %v530_v57  ;;  %v2231_v60 = vsel %vm542_vm5, %v521_v56, %v539_v58  ;;  %vm791_vm5 = vcmp.lt.s32.totalorder %v2160_v21, 19 }
 0x36a   : > { %547 = vrot.lane.b32.xlu1 %v2231_v60, %s1883_s8  ;;  %545 = vrot.lane.b32.xlu0 %v2229_v59, %s1883_s8  ;;  %s1897_s8 = smov 19  }
 0x36e   : > { %558 = vrot.lane.b32.xlu1 %v2229_v59, %s1884_s25  ;;  %577 = vrot.lane.b32.xlu0 %v2229_v59, %s1885_s14 }
 0x372   : > { %560 = vrot.lane.b32.xlu1 %v2231_v60, %s1884_s25  ;;  %596 = vrot.lane.b32.xlu0 %v2229_v59, %s1886_s5  ;;  %s1898_s25 = smov 18  }
 0x376   : > { %579 = vrot.lane.b32.xlu1 %v2231_v60, %s1885_s14  ;;  %615 = vrot.lane.b32.xlu0 %v2229_v59, %s1887_s21  ;;  %s1899_s14 = smov 17  }
 0x37a   : > { %598 = vrot.lane.b32.xlu1 %v2231_v60, %s1886_s5  ;;  %628 = vrot.lane.b32.xlu0 %v2229_v59, %s1888_s23  ;;  %s1900_s5 = smov 16  }
 0x37e   : > { %617 = vrot.lane.b32.xlu1 %v2231_v60, %s1887_s21  ;;  %647 = vrot.lane.b32.xlu0 %v2229_v59, %s1889_s12  ;;  %s1901_s21 = smov 15  }
 0x382   : > { %630 = vrot.lane.b32.xlu1 %v2231_v60, %s1888_s23  ;;  %666 = vrot.lane.b32.xlu0 %v2229_v59, %s1890_s13  ;;  %s1902_s23 = smov 14  }
 0x386   : > { %649 = vrot.lane.b32.xlu1 %v2231_v60, %s1889_s12  ;;  %685 = vrot.lane.b32.xlu0 %v2229_v59, %s1891_s9  ;;  %s1903_s12 = smov 13  }
 0x38a   : > { %668 = vrot.lane.b32.xlu1 %v2231_v60, %s1890_s13  ;;  %698 = vrot.lane.b32.xlu0 %v2229_v59, %s1892_s28  ;;  %s1904_s13 = smov 3  }
 0x38e   : > { %687 = vrot.lane.b32.xlu1 %v2231_v60, %s1891_s9  ;;  %717 = vrot.lane.b32.xlu0 %v2229_v59, %s1893_s10  ;;  %s1905_s9 = smov 2  }
 0x392   : > { %700 = vrot.lane.b32.xlu1 %v2231_v60, %s1892_s28  ;;  %736 = vrot.lane.b32.xlu0 %v2229_v59, %s1894_s6  ;;  %s1906_s28 = smov 1  }
 0x396   : > { %719 = vrot.lane.b32.xlu1 %v2231_v60, %s1893_s10  ;;  %755 = vrot.lane.b32.xlu0 %v2229_v59, %s1895_s7  ;;  %s1907_s10 = smov 127  }
 0x39a   : > { %738 = vrot.lane.b32.xlu1 %v2231_v60, %s1894_s6  ;;  %768 = vrot.lane.b32.xlu0 %v2229_v59, %s1896_s26  ;;  %s1908_s6 = smov 126  }
 0x39e   : > { %757 = vrot.lane.b32.xlu1 %v2231_v60, %s1895_s7  ;;  %787 = vrot.lane.b32.xlu0 %v2229_v59, %s1897_s8  ;;  %s1909_s7 = smov 125  }
 0x3a2   : > { %770 = vrot.lane.b32.xlu1 %v2231_v60, %s1896_s26  ;;  %806 = vrot.lane.b32.xlu0 %v2229_v59, %s1898_s25  ;;  %s1910_s26 = smov 115  }
 0x3a6   : > { %789 = vrot.lane.b32.xlu1 %v2231_v60, %s1897_s8  ;;  %825 = vrot.lane.b32.xlu0 %v2229_v59, %s1899_s14  ;;  %s1911_s8 = smov 114  }
 0x3aa   : > { %808 = vrot.lane.b32.xlu1 %v2231_v60, %s1898_s25  ;;  %838 = vrot.lane.b32.xlu0 %v2229_v59, %s1900_s5  ;;  %s1912_s25 = smov 113  }
 0x3ae   : > { %827 = vrot.lane.b32.xlu1 %v2231_v60, %s1899_s14  ;;  %857 = vrot.lane.b32.xlu0 %v2229_v59, %s1901_s21  ;;  %s1913_s14 = smov 112  }
 0x3b2   : > { %840 = vrot.lane.b32.xlu1 %v2231_v60, %s1900_s5  ;;  %876 = vrot.lane.b32.xlu0 %v2229_v59, %s1902_s23 }
 0x3b6   : > { %859 = vrot.lane.b32.xlu1 %v2231_v60, %s1901_s21  ;;  %895 = vrot.lane.b32.xlu0 %v2229_v59, %s1903_s12  ;;  %s1914_s21 = smov 111  }
 0x3ba   : > { %878 = vrot.lane.b32.xlu1 %v2231_v60, %s1902_s23  ;;  %908 = vrot.lane.b32.xlu0 %v2229_v59, %s1904_s13  ;;  %s1915_s23 = smov 110  }
 0x3be   : > { %897 = vrot.lane.b32.xlu1 %v2231_v60, %s1903_s12  ;;  %927 = vrot.lane.b32.xlu0 %v2229_v59, %s1905_s9  ;;  %s1916_s12 = smov 109  }
 0x3c2   : > { %910 = vrot.lane.b32.xlu1 %v2231_v60, %s1904_s13  ;;  %946 = vrot.lane.b32.xlu0 %v2229_v59, %s1906_s28  ;;  %s1917_s13 = smov 99  }
 0x3c6   : > { %929 = vrot.lane.b32.xlu1 %v2231_v60, %s1905_s9  ;;  %971 = vrot.lane.b32.xlu0 %v2229_v59, %s1907_s10  ;;  %s1918_s9 = smov 98  }
 0x3ca   : > { %948 = vrot.lane.b32.xlu1 %v2231_v60, %s1906_s28  ;;  %990 = vrot.lane.b32.xlu0 %v2229_v59, %s1908_s6  ;;  %s1919_s28 = smov 97  }
 0x3ce   : > { %973 = vrot.lane.b32.xlu1 %v2231_v60, %s1907_s10  ;;  %1009 = vrot.lane.b32.xlu0 %v2229_v59, %s1909_s7  ;;  %s1920_s10 = smov 96  }
 0x3d2   : > { %992 = vrot.lane.b32.xlu1 %v2231_v60, %s1908_s6  ;;  %1028 = vrot.lane.b32.xlu0 %v2229_v59, %s1910_s26  ;;  %s1921_s6 = smov 95  }
 0x3d6   : > { %1011 = vrot.lane.b32.xlu1 %v2231_v60, %s1909_s7  ;;  %1041 = vrot.lane.b32.xlu0 %v2229_v59, %s1911_s8  ;;  %s1922_s7 = smov 94  }
 0x3da   : > { %1030 = vrot.lane.b32.xlu1 %v2231_v60, %s1910_s26  ;;  %1060 = vrot.lane.b32.xlu0 %v2229_v59, %s1912_s25  ;;  %s1923_s26 = smov 93  }
 0x3dc   : > { %v548_v18 = vpop.permute.xlu1 %547  ;;  %v546_v61 = vpop.permute.xlu0 %545 }
 0x3dd   : > { %v550_v62 = vsel %vm549_vm6, %v546_v61, %v548_v18  ;;  %v551_v63 = vsel %vm549_vm6, %v548_v18, %v546_v61  ;;  %vm810_vm6 = vcmp.lt.s32.totalorder %v2160_v21, 18 }
 0x3de   : > { %1043 = vrot.lane.b32.xlu1 %v2231_v60, %s1911_s8  ;;  %1079 = vrot.lane.b32.xlu0 %v2229_v59, %s1913_s14  ;;  %v554_v26 = vmul.f32 %v552_v12, %v551_v63  ;;  %v555_v28 = vmul.f32 %v553_v22, %v550_v62  ;;  %v639_v63 = vrot.slane %v635_v52, 2  ;;  %s1924_s8 = smov 83  }
 0x3e0   : > { %v559_v6 = vpop.permute.xlu1 %558  ;;  %v578_v7 = vpop.permute.xlu0 %577 }
 0x3e2   : > { %1062 = vrot.lane.b32.xlu1 %v2231_v60, %s1912_s25  ;;  %1098 = vrot.lane.b32.xlu0 %v2229_v59, %s1914_s21  ;;  %s1925_s25 = smov 82  }
 0x3e4   : > { %v561_v2 = vpop.permute.xlu1 %560  ;;  %v597_v5 = vpop.permute.xlu0 %596 }
 0x3e5   : > { %v563_v8 = vsel %vm562_vm7, %v559_v6, %v561_v2  ;;  %v564_v9 = vsel %vm562_vm7, %v561_v2, %v559_v6  ;;  %v655_v6 = vld [vmem:[#allocation5 + $0x18] sm:$0x30]  ;;  %vm829_vm7 = vcmp.lt.s32.totalorder %v2160_v21, 17 }
 0x3e6   : > { %v573_v10 = vmul.f32 %v569_v13, %v564_v9  ;;  %v574_v29 = vmul.f32 %v570_v14, %v563_v8  ;;  %1081 = vrot.lane.b32.xlu1 %v2231_v60, %s1913_s14  ;;  %1111 = vrot.lane.b32.xlu0 %v2229_v59, %s1915_s23  ;;  %v673_v8 = vld [vmem:[#allocation5 + $0x10] sm:$0xc0]  ;;  %v674_v9 = vld [vmem:[#allocation5 + $0x18] sm:$0xc0]  ;;  %s1926_s14 = smov 81  }
 0x3e8   : > { %v575_v32 = vadd.f32 %v573_v10, %v554_v26  ;;  %v576_v33 = vadd.f32 %v574_v29, %v555_v28  ;;  %v580_v34 = vpop.permute.xlu1 %579  ;;  %v616_v35 = vpop.permute.xlu0 %615  ;;  %v659_v26 = vrot.slane %v655_v6, 4 }
 0x3e9   : > { %v582_v36 = vsel %vm581_vm8, %v578_v7, %v580_v34  ;;  %v583_v37 = vsel %vm581_vm8, %v580_v34, %v578_v7  ;;  %v678_v34 = vrot.slane %v674_v9, 6  ;;  %vm842_vm8 = vcmp.lt.s32.totalorder %v2160_v21, 16 }
 0x3ea   : > { %v592_v38 = vmul.f32 %v588_v27, %v583_v37  ;;  %v593_v39 = vmul.f32 %v589_v11, %v582_v36  ;;  %1100 = vrot.lane.b32.xlu1 %v2231_v60, %s1914_s21  ;;  %1130 = vrot.lane.b32.xlu0 %v2229_v59, %s1916_s12  ;;  %s1927_s21 = smov 80  }
 0x3ec   : > { %v594_v42 = vadd.f32 %v592_v38, %v575_v32  ;;  %v595_v43 = vadd.f32 %v593_v39, %v576_v33  ;;  %v599_v44 = vpop.permute.xlu1 %598  ;;  %v629_v45 = vpop.permute.xlu0 %628  ;;  %v677_v33 = vrot.slane %v673_v8, 6 }
 0x3ed   : > { %v601_v46 = vsel %vm600_vm9, %v597_v5, %v599_v44  ;;  %v602_v47 = vsel %vm600_vm9, %v599_v44, %v597_v5  ;;  %v658_v5 = vrot.slane %v654_v4, 4  ;;  %v693_v44 = vld [vmem:[#allocation5 + $0x28] sm:$0x3]  ;;  %vm861_vm9 = vcmp.lt.s32.totalorder %v2160_v21, 15 }
 0x3ee   : > { %v611_v48 = vmul.f32 %v607_v40, %v602_v47  ;;  %v612_v49 = vmul.f32 %v608_v41, %v601_v46  ;;  %1113 = vrot.lane.b32.xlu1 %v2231_v60, %s1915_s23  ;;  %1149 = vrot.lane.b32.xlu0 %v2229_v59, %s1917_s13  ;;  %v706_v46 = vld [vmem:[#allocation5 + $0x28] sm:$0xc]  ;;  %s1928_s23 = smov 79  }
 0x3f0   : > { %v613_v54 = vadd.f32 %v611_v48, %v594_v42  ;;  %v614_v55 = vadd.f32 %v612_v49, %v595_v43  ;;  %v618_v56 = vpop.permute.xlu1 %617  ;;  %v648_v57 = vpop.permute.xlu0 %647  ;;  %v692_v43 = vld [vmem:[#allocation5 + $0x20] sm:$0x3] }
 0x3f1   : > { %v620_v58 = vsel %vm619_vm10, %v616_v35, %v618_v56  ;;  %v621_v18 = vsel %vm619_vm10, %v618_v56, %v616_v35  ;;  %v710_v56 = vrot.slane %v706_v46, 2  ;;  %vm880_vm10 = vcmp.lt.s32.totalorder %v2160_v21, 14 }
 0x3f2   : > { %v624_v61 = vmul.f32 %v622_v50, %v621_v18  ;;  %v625_v62 = vmul.f32 %v623_v51, %v620_v58  ;;  %1132 = vrot.lane.b32.xlu1 %v2231_v60, %s1916_s12  ;;  %1168 = vrot.lane.b32.xlu0 %v2229_v59, %s1918_s9  ;;  %v725_v58 = vld [vmem:[#allocation5 + $0x28] sm:$0x30]  ;;  %s1929_s12 = smov 78  }
 0x3f4   : > { %v626_v7 = vadd.f32 %v624_v61, %v613_v54  ;;  %v627_v12 = vadd.f32 %v625_v62, %v614_v55  ;;  %v631_v13 = vpop.permute.xlu1 %630  ;;  %v667_v14 = vpop.permute.xlu0 %666 }
 0x3f5   : > { %v633_v15 = vsel %vm632_vm11, %v629_v45, %v631_v13  ;;  %v634_v22 = vsel %vm632_vm11, %v631_v13, %v629_v45  ;;  %v705_v45 = vld [vmem:[#allocation5 + $0x20] sm:$0xc]  ;;  %v729_v13 = vrot.slane %v725_v58, 4  ;;  %vm899_vm11 = vcmp.lt.s32.totalorder %v2160_v21, 13 }
 0x3f6   : > { %v643_v23 = vmul.f32 %v639_v63, %v634_v22  ;;  %v644_v2 = vmul.f32 %v640_v3, %v633_v15  ;;  %1151 = vrot.lane.b32.xlu1 %v2231_v60, %s1917_s13  ;;  %1181 = vrot.lane.b32.xlu0 %v2229_v59, %s1919_s28  ;;  %v709_v55 = vrot.slane %v705_v45, 2  ;;  %v744_v15 = vld [vmem:[#allocation5 + $0x28] sm:$0xc0]  ;;  %s1930_s13 = smov 77  }
 0x3f8   : > { %v645_v27 = vadd.f32 %v643_v23, %v626_v7  ;;  %v646_v28 = vadd.f32 %v644_v2, %v627_v12  ;;  %v650_v10 = vpop.permute.xlu1 %649  ;;  %v686_v29 = vpop.permute.xlu0 %685 }
 0x3f9   : > { %v652_v11 = vsel %vm651_vm12, %v648_v57, %v650_v10  ;;  %v653_v30 = vsel %vm651_vm12, %v650_v10, %v648_v57  ;;  %v724_v57 = vld [vmem:[#allocation5 + $0x20] sm:$0x30]  ;;  %v748_v10 = vrot.slane %v744_v15, 6  ;;  %vm912_vm12 = vcmp.lt.s32.totalorder %v2160_v21, 3 }
 0x3fa   : > { %v662_v31 = vmul.f32 %v658_v5, %v653_v30  ;;  %v663_v32 = vmul.f32 %v659_v26, %v652_v11  ;;  %1170 = vrot.lane.b32.xlu1 %v2231_v60, %s1918_s9  ;;  %1200 = vrot.lane.b32.xlu0 %v2229_v59, %s1920_s10  ;;  %v728_v12 = vrot.slane %v724_v57, 4  ;;  %s1567_s9 = sshll.u32 %s1979_s19, 10 }
 0x3fc   : > { %v664_v35 = vadd.f32 %v662_v31, %v645_v27  ;;  %v665_v36 = vadd.f32 %v663_v32, %v646_v28  ;;  %v669_v37 = vpop.permute.xlu1 %668  ;;  %v699_v38 = vpop.permute.xlu0 %698 }
 0x3fd   : > { %v671_v39 = vsel %vm670_vm13, %v667_v14, %v669_v37  ;;  %v672_v40 = vsel %vm670_vm13, %v669_v37, %v667_v14  ;;  %v743_v14 = vld [vmem:[#allocation5 + $0x20] sm:$0xc0]  ;;  %v763_v37 = vld [vmem:[#allocation5 + $0x38] sm:$0x3]  ;;  %vm931_vm13 = vcmp.lt.s32.totalorder %v2160_v21, 2 }
 0x3fe   : > { %v681_v41 = vmul.f32 %v677_v33, %v672_v40  ;;  %v682_v42 = vmul.f32 %v678_v34, %v671_v39  ;;  %1183 = vrot.lane.b32.xlu1 %v2231_v60, %s1919_s28  ;;  %1219 = vrot.lane.b32.xlu0 %v2229_v59, %s1921_s6  ;;  %v747_v28 = vrot.slane %v743_v14, 6  ;;  %v776_v39 = vld [vmem:[#allocation5 + $0x38] sm:$0xc]  ;;  %s2796_s28 = scalar_lea.vmem [#allocation7], %s1546_s20 }
 0x400   : > { %v683_v47 = vadd.f32 %v681_v41, %v664_v35  ;;  %v684_v48 = vadd.f32 %v682_v42, %v665_v36  ;;  %v688_v49 = vpop.permute.xlu1 %687  ;;  %v718_v50 = vpop.permute.xlu0 %717  ;;  %v762_v36 = vld [vmem:[#allocation5 + $0x30] sm:$0x3] }
 0x401   : > { %v690_v51 = vsel %vm689_vm14, %v686_v29, %v688_v49  ;;  %v691_v52 = vsel %vm689_vm14, %v688_v49, %v686_v29  ;;  %v780_v49 = vrot.slane %v776_v39, 2  ;;  %vm950_vm14 = vcmp.lt.s32.totalorder %v2160_v21, 1 }
 0x402   : > { %v694_v53 = vmul.f32 %v692_v43, %v691_v52  ;;  %v695_v54 = vmul.f32 %v693_v44, %v690_v51  ;;  %1202 = vrot.lane.b32.xlu1 %v2231_v60, %s1920_s10  ;;  %1238 = vrot.lane.b32.xlu0 %v2229_v59, %s1922_s7  ;;  %v795_v51 = vld [vmem:[#allocation5 + $0x38] sm:$0x30]  ;;  %s1455_s10 = sshll.u32 %s2796_s28, 4  ;;  %s2816_s10 = int_to_ptr.vmem [resolvable:$true] %s1455_s10 }
 0x404   : > { %v696_v18 = vadd.f32 %v694_v53, %v683_v47  ;;  %v697_v61 = vadd.f32 %v695_v54, %v684_v48  ;;  %v701_v62 = vpop.permute.xlu1 %700  ;;  %v737_v63 = vpop.permute.xlu0 %736 }
 0x405   : > { %v703_v3 = vsel %vm702_vm15, %v699_v38, %v701_v62  ;;  %v704_v4 = vsel %vm702_vm15, %v701_v62, %v699_v38  ;;  %v775_v38 = vld [vmem:[#allocation5 + $0x30] sm:$0xc]  ;;  %v799_v62 = vrot.slane %v795_v51, 4  ;;  %v845_v51 = vld [vmem:[#allocation5 + $0x40] sm:$0xc]  ;;  %vm975_vm15 = vcmp.lt.s32.totalorder %v2160_v21, 127 }
 0x406   : > { %v713_v6 = vmul.f32 %v709_v55, %v704_v4  ;;  %v714_v7 = vmul.f32 %v710_v56, %v703_v3  ;;  %1221 = vrot.lane.b32.xlu1 %v2231_v60, %s1921_s6  ;;  %1251 = vrot.lane.b32.xlu0 %v2229_v59, %s1923_s26  ;;  %v779_v48 = vrot.slane %v775_v38, 2  ;;  %s2810_s6 = scalar_lea.hbm %s2873_s4, %s1567_s9 }
 0x408   : > { %v715_v22 = vadd.f32 %v713_v6, %v696_v18  ;;  %v716_v23 = vadd.f32 %v714_v7, %v697_v61  ;;  %v720_v2 = vpop.permute.xlu1 %719  ;;  %v756_v5 = vpop.permute.xlu0 %755 }
 0x409   : > { %v722_v26 = vsel %vm721_vm0, %v718_v50, %v720_v2  ;;  %v723_v8 = vsel %vm721_vm0, %v720_v2, %v718_v50  ;;  %v794_v50 = vld [vmem:[#allocation5 + $0x30] sm:$0x30]  ;;  %vm994_vm0 = vcmp.lt.s32.totalorder %v2160_v21, 126 }
 0x40a   : > { %v732_v9 = vmul.f32 %v728_v12, %v723_v8  ;;  %v733_v27 = vmul.f32 %v729_v13, %v722_v26  ;;  %1240 = vrot.lane.b32.xlu1 %v2231_v60, %s1922_s7  ;;  %1270 = vrot.lane.b32.xlu0 %v2229_v59, %s1924_s8  ;;  %v798_v61 = vrot.slane %v794_v50, 4  ;;  %s1442_s7 = scalar_lea.sflag [#allocation4], %s2103_s11 }
 0x40c   : > { %v734_v29 = vadd.f32 %v732_v9, %v715_v22  ;;  %v735_v11 = vadd.f32 %v733_v27, %v716_v23  ;;  %v739_v30 = vpop.permute.xlu1 %738  ;;  %v769_v31 = vpop.permute.xlu0 %768 }
 0x40d   : > { %v741_v32 = vsel %vm740_vm1, %v737_v63, %v739_v30  ;;  %v742_v33 = vsel %vm740_vm1, %v739_v30, %v737_v63  ;;  %vm1013_vm1 = vcmp.lt.s32.totalorder %v2160_v21, 125 }
 0x40e   : > { %v751_v34 = vmul.f32 %v747_v28, %v742_v33  ;;  %v752_v35 = vmul.f32 %v748_v10, %v741_v32  ;;  %1253 = vrot.lane.b32.xlu1 %v2231_v60, %s1923_s26  ;;  %1289 = vrot.lane.b32.xlu0 %v2229_v59, %s1925_s25  ;;  %s1804_s26 = scalar_lea.vmem %s2816_s10, 1024 }
 0x40f   : > { %p1805_p4 = scmp.ne.s32.totalorder %s2816_s10, %s1804_s26 }
 0x410   : > { %v753_v40 = vadd.f32 %v751_v34, %v734_v29  ;;  %v754_v41 = vadd.f32 %v752_v35, %v735_v11  ;;  %v758_v42 = vpop.permute.xlu1 %757  ;;  %v788_v43 = vpop.permute.xlu0 %787 }
 0x411   : > { %v760_v44 = vsel %vm759_vm2, %v756_v5, %v758_v42  ;;  %v761_v45 = vsel %vm759_vm2, %v758_v42, %v756_v5  ;;  %vm1032_vm2 = vcmp.lt.s32.totalorder %v2160_v21, 115  ;;  %p1806_p6 = pnand %p1805_p4, %p2052_p12 }
 0x412   : > { %v764_v46 = vmul.f32 %v762_v36, %v761_v45  ;;  %v765_v47 = vmul.f32 %v763_v37, %v760_v44  ;;  %1272 = vrot.lane.b32.xlu1 %v2231_v60, %s1924_s8  ;;  %1308 = vrot.lane.b32.xlu0 %v2229_v59, %s1926_s14  ;;  %v813_v45 = vld [vmem:[#allocation5 + $0x30] sm:$0xc0] }
 0x413   : > { %p1807_p8 = pneg %p1806_p6 }
 0x414   : > { %v766_v52 = vadd.f32 %v764_v46, %v753_v40  ;;  %v767_v53 = vadd.f32 %v765_v47, %v754_v41  ;;  %v771_v54 = vpop.permute.xlu1 %770  ;;  %v2350_v55 = vpop.permute.xlu0 %806  ;;  %v814_v46 = vld [vmem:[#allocation5 + $0x38] sm:$0xc0] }
 0x415   : > { %v773_v56 = vsel %vm772_vm3, %v769_v31, %v771_v54  ;;  %v774_v57 = vsel %vm772_vm3, %v771_v54, %v769_v31  ;;  %v818_v50 = vrot.slane %v814_v46, 6  ;;  %vm1045_vm3 = vcmp.lt.s32.totalorder %v2160_v21, 114 }
 0x416   : > { %v783_v58 = vmul.f32 %v779_v48, %v774_v57  ;;  %v784_v18 = vmul.f32 %v780_v49, %v773_v56  ;;  %1291 = vrot.lane.b32.xlu1 %v2231_v60, %s1925_s25  ;;  %1321 = vrot.lane.b32.xlu0 %v2229_v59, %s1927_s21  ;;  %v817_v49 = vrot.slane %v813_v45, 6  ;;  %v832_v56 = vld [vmem:[#allocation5 + $0x40] sm:$0x3]  ;;  %v864_v57 = vld [vmem:[#allocation5 + $0x40] sm:$0x30] }
 0x418   : > { %v785_v63 = vadd.f32 %v783_v58, %v766_v52  ;;  %v786_v3 = vadd.f32 %v784_v18, %v767_v53  ;;  %v790_v4 = vpop.permute.xlu1 %789  ;;  %v2356_v6 = vpop.permute.xlu0 %825  ;;  %v846_v52 = vld [vmem:[#allocation5 + $0x48] sm:$0xc]  ;;  %v833_v58 = vld [vmem:[#allocation5 + $0x48] sm:$0x3]  ;;  %v865_v18 = vld [vmem:[#allocation5 + $0x48] sm:$0x30] }
 0x419   : > { %v792_v7 = vsel %vm791_vm5, %v788_v43, %v790_v4  ;;  %v793_v12 = vsel %vm791_vm5, %v790_v4, %v788_v43  ;;  %v849_v4 = vrot.slane %v845_v51, 2  ;;  %v869_v25 = vrot.slane %v865_v18, 4  ;;  %v916_v51 = vld [vmem:[#allocation5 + $0x58] sm:$0xc] }
 0x41a   : > { %v802_v13 = vmul.f32 %v798_v61, %v793_v12  ;;  %v803_v14 = vmul.f32 %v799_v62, %v792_v7  ;;  %1310 = vrot.lane.b32.xlu1 %v2231_v60, %s1926_s14  ;;  %1340 = vrot.lane.b32.xlu0 %v2229_v59, %s1928_s23  ;;  %v850_v7 = vrot.slane %v846_v52, 2  ;;  %v883_v12 = vld [vmem:[#allocation5 + $0x40] sm:$0xc0]  ;;  %v920_v18 = vrot.slane %v916_v51, 2 }
 0x41b   : > { %v887_v20 = vrot.slane %v883_v12, 6  ;;  %vm1064_vm5 = vcmp.lt.s32.totalorder %v2160_v21, 113 }
 0x41c   : > { %v2360_v15 = vadd.f32 %v802_v13, %v785_v63  ;;  %v2362_v22 = vadd.f32 %v803_v14, %v786_v3  ;;  %v809_v23 = vpop.permute.xlu1 %808  ;;  %v2364_v2 = vpop.permute.xlu0 %838  ;;  %v884_v13 = vld [vmem:[#allocation5 + $0x48] sm:$0xc0] }
 0x41d   : > { %v811_v53 = vsel %vm810_vm6, %v2350_v55, %v809_v23  ;;  %v812_v54 = vsel %vm810_vm6, %v809_v23, %v2350_v55  ;;  %v868_v23 = vrot.slane %v864_v57, 4  ;;  %v934_v57 = vld [vmem:[#allocation5 + $0x50] sm:$0x30]  ;;  %vm1083_vm6 = vcmp.lt.s32.totalorder %v2160_v21, 112 }
 0x41e   : > { %1323 = vrot.lane.b32.xlu1 %v2231_v60, %s1927_s21  ;;  %1359 = vrot.lane.b32.xlu0 %v2229_v59, %s1929_s12  ;;  %v821_v14 = vmul.f32 %v817_v49, %v812_v54  ;;  %v822_v55 = vmul.f32 %v818_v50, %v811_v53 }
 0x420   : > { %v828_v5 = vpop.permute.xlu1 %827  ;;  %v2368_v26 = vpop.permute.xlu0 %857 }
 0x421   : > { %v830_v63 = vsel %vm829_vm7, %v2356_v6, %v828_v5  ;;  %v831_v3 = vsel %vm829_vm7, %v828_v5, %v2356_v6  ;;  %v888_v6 = vrot.slane %v884_v13, 6  ;;  %v915_v5 = vld [vmem:[#allocation5 + $0x50] sm:$0xc]  ;;  %v902_v13 = vld [vmem:[#allocation5 + $0x50] sm:$0x3]  ;;  %vm1102_vm7 = vcmp.lt.s32.totalorder %v2160_v21, 111 }
 0x422   : > { %1342 = vrot.lane.b32.xlu1 %v2231_v60, %s1928_s23  ;;  %1378 = vrot.lane.b32.xlu0 %v2229_v59, %s1930_s13  ;;  %v834_v1 = vmul.f32 %v832_v56, %v831_v3  ;;  %v835_v17 = vmul.f32 %v833_v58, %v830_v63 }
 0x424   : > { %v841_v8 = vpop.permute.xlu1 %840  ;;  %v2372_v9 = vpop.permute.xlu0 %876 }
 0x425   : > { %v843_v45 = vsel %vm842_vm8, %v2364_v2, %v841_v8  ;;  %v844_v46 = vsel %vm842_vm8, %v841_v8, %v2364_v2  ;;  %v823_v2 = vadd.f32 %v821_v14, %v2360_v15  ;;  %v824_v8 = vadd.f32 %v822_v55, %v2362_v22  ;;  %v935_v22 = vld [vmem:[#allocation5 + $0x58] sm:$0x30]  ;;  %v903_v14 = vld [vmem:[#allocation5 + $0x58] sm:$0x3] }
 0x426   : > { %1361 = vrot.lane.b32.xlu1 %v2231_v60, %s1929_s12  ;;  %v853_v54 = vmul.f32 %v849_v4, %v844_v46  ;;  %v854_v56 = vmul.f32 %v850_v7, %v843_v45  ;;  %v953_v45 = vld [vmem:[#allocation5 + $0x50] sm:$0xc0]  ;;  %v954_v46 = vld [vmem:[#allocation5 + $0x58] sm:$0xc0]  ;;  %vm1115_vm8 = vcmp.lt.s32.totalorder %v2160_v21, 110 }
 0x427   : > { %v836_v63 = vadd.f32 %v834_v1, %v823_v2  ;;  %v837_v3 = vadd.f32 %v835_v17, %v824_v8  ;;  %v938_v17 = vrot.slane %v934_v57, 4 }
 0x428   : > { %v2375_v27 = vpop.permute.xlu1 %859  ;;  %v2377_v28 = vpop.permute.xlu0 %895 }
 0x429   : > { %v862_v50 = vsel %vm861_vm9, %v2368_v26, %v2375_v27  ;;  %v863_v53 = vsel %vm861_vm9, %v2375_v27, %v2368_v26  ;;  %v919_v27 = vrot.slane %v915_v5, 2  ;;  %vm1134_vm9 = vcmp.lt.s32.totalorder %v2160_v21, 109 }
 0x42a   : > { %1380 = vrot.lane.b32.xlu1 %v2231_v60, %s1930_s13  ;;  %v872_v15 = vmul.f32 %v868_v23, %v863_v53  ;;  %v873_v12 = vmul.f32 %v869_v25, %v862_v50  ;;  %v855_v25 = vadd.f32 %v853_v54, %v836_v63  ;;  %v958_v54 = vrot.slane %v954_v46, 6 }
 0x42c   : > { %v2380_v10 = vpop.permute.xlu1 %878  ;;  %v2382_v29 = vpop.permute.xlu0 %908 }
 0x42d   : > { %v881_v58 = vsel %vm880_vm10, %v2372_v9, %v2380_v10  ;;  %v882_v26 = vsel %vm880_vm10, %v2380_v10, %v2372_v9  ;;  %v856_v9 = vadd.f32 %v854_v56, %v837_v3  ;;  %vm1153_vm10 = vcmp.lt.s32.totalorder %v2160_v21, 99 }
 0x42e   : > { %v891_v10 = vmul.f32 %v887_v20, %v882_v26  ;;  %v892_v23 = vmul.f32 %v888_v6, %v881_v58 }
 0x42f   : > { %v875_v50 = vadd.f32 %v873_v12, %v856_v9 }
 0x430   : > { %v2384_v11 = vpop.permute.xlu1 %897  ;;  %v2386_v30 = vpop.permute.xlu0 %927 }
 0x431   : > { %v900_v55 = vsel %vm899_vm11, %v2377_v28, %v2384_v11  ;;  %v901_v1 = vsel %vm899_vm11, %v2384_v11, %v2377_v28  ;;  %v939_v28 = vrot.slane %v935_v22, 4  ;;  %v874_v11 = vadd.f32 %v872_v15, %v855_v25 }
 0x432   : > { %v904_v53 = vmul.f32 %v902_v13, %v901_v1  ;;  %v905_v20 = vmul.f32 %v903_v14, %v900_v55  ;;  %v894_v57 = vadd.f32 %v892_v23, %v875_v50  ;;  %v979_v13 = vld [vmem:[#allocation5 + $0x68] sm:$0xc]  ;;  %v2501_v23 = vld [vmem:[#allocation5 + $0x60] sm:$0xc0]  ;;  %v2509_v50 = vld [vmem:[#allocation5 + $0x78] sm:$0xc] }
 0x433   : > { %v893_v56 = vadd.f32 %v891_v10, %v874_v11  ;;  %v998_v10 = vld [vmem:[#allocation5 + $0x68] sm:$0x30]  ;;  %v983_v46 = vrot.slane %v979_v13, 2  ;;  %v2507_v11 = vld [vmem:[#allocation5 + $0x70] sm:$0xc]  ;;  %vm1172_vm11 = vcmp.lt.s32.totalorder %v2160_v21, 98 }
 0x434   : > { %v2388_v31 = vpop.permute.xlu1 %910  ;;  %v2390_v32 = vpop.permute.xlu0 %946  ;;  %v907_v12 = vadd.f32 %v905_v20, %v894_v57  ;;  %v2540_v13 = vld [vmem:[#allocation5 + $0x78] sm:$0xc0] }
 0x435   : > { %v913_v5 = vsel %vm912_vm12, %v2382_v29, %v2388_v31  ;;  %v914_v51 = vsel %vm912_vm12, %v2388_v31, %v2382_v29  ;;  %v957_v31 = vrot.slane %v953_v45, 6  ;;  %v906_v15 = vadd.f32 %v904_v53, %v893_v56  ;;  %v2503_v45 = vld [vmem:[#allocation5 + $0x68] sm:$0xc0] }
 0x436   : > { %v923_v58 = vmul.f32 %v919_v27, %v914_v51  ;;  %v924_v26 = vmul.f32 %v920_v18, %v913_v5  ;;  %v997_v18 = vld [vmem:[#allocation5 + $0x60] sm:$0x30]  ;;  %vm1185_vm12 = vcmp.lt.s32.totalorder %v2160_v21, 97 }
 0x438   : > { %v2392_v33 = vpop.permute.xlu1 %929  ;;  %v2394_v34 = vpop.permute.xlu0 %971  ;;  %v925_v55 = vadd.f32 %v923_v58, %v906_v15  ;;  %v926_v1 = vadd.f32 %v924_v26, %v907_v12  ;;  %v2522_v58 = vld [vmem:[#allocation5 + $0x78] sm:$0x30]  ;;  %v1053_v15 = vrot.slane %v2509_v50, 2  ;;  %v1036_v50 = vld [vmem:[#allocation5 + $0x78] sm:$0x3] }
 0x439   : > { %v932_v8 = vsel %vm931_vm13, %v2386_v30, %v2392_v33  ;;  %v933_v29 = vsel %vm931_vm13, %v2392_v33, %v2386_v30  ;;  %v978_v33 = vld [vmem:[#allocation5 + $0x60] sm:$0xc]  ;;  %vm1204_vm13 = vcmp.lt.s32.totalorder %v2160_v21, 96 }
 0x43a   : > { %v942_v22 = vmul.f32 %v938_v17, %v933_v29  ;;  %v943_v30 = vmul.f32 %v939_v28, %v932_v8  ;;  %v982_v17 = vrot.slane %v978_v33, 2  ;;  %v1001_v28 = vrot.slane %v997_v18, 4  ;;  %v2538_v33 = vld [vmem:[#allocation5 + $0x70] sm:$0xc0] }
 0x43b   : > { %v1002_v8 = vrot.slane %v998_v10, 4  ;;  %v1020_v29 = vrot.slane %v2501_v23, 6  ;;  %v2556_v10 = vld [vmem:[#allocation5 + $0x80] sm:$0xc]  ;;  %v2558_v23 = vld [vmem:[#allocation5 + $0x88] sm:$0xc] }
 0x43c   : > { %v2396_v35 = vpop.permute.xlu1 %948  ;;  %v2398_v36 = vpop.permute.xlu0 %990  ;;  %v944_v5 = vadd.f32 %v942_v22, %v925_v55  ;;  %v945_v51 = vadd.f32 %v943_v30, %v926_v1 }
 0x43d   : > { %v951_v63 = vsel %vm950_vm14, %v2390_v32, %v2396_v35  ;;  %v952_v3 = vsel %vm950_vm14, %v2396_v35, %v2390_v32  ;;  %v965_v32 = vld [vmem:[#allocation5 + $0x60] sm:$0x3]  ;;  %v966_v35 = vld [vmem:[#allocation5 + $0x68] sm:$0x3]  ;;  %vm1223_vm14 = vcmp.lt.s32.totalorder %v2160_v21, 95 }
 0x43e   : > { %v961_v25 = vmul.f32 %v957_v31, %v952_v3  ;;  %v962_v9 = vmul.f32 %v958_v54, %v951_v63  ;;  %v1021_v31 = vrot.slane %v2503_v45, 6  ;;  %v2518_v54 = vld [vmem:[#allocation5 + $0x70] sm:$0x30]  ;;  %v1052_v3 = vrot.slane %v2507_v11, 2  ;;  %v1035_v11 = vld [vmem:[#allocation5 + $0x70] sm:$0x3] }
 0x43f   : > { %v968_v12 = vmul.f32 %v966_v35, %v2231_v60  ;;  %v967_v22 = vmul.f32 %v965_v32, %v2229_v59  ;;  %v1071_v30 = vrot.slane %v2518_v54, 4  ;;  %v1072_v60 = vrot.slane %v2522_v58, 4 }
 0x440   : > { %v2400_v37 = vpop.permute.xlu1 %973  ;;  %v2402_v38 = vpop.permute.xlu0 %1009  ;;  %v963_v56 = vadd.f32 %v961_v25, %v944_v5  ;;  %v964_v57 = vadd.f32 %v962_v9, %v945_v51  ;;  %v1091_v32 = vrot.slane %v2540_v13, 6  ;;  %v2600_v13 = vld [vmem:[#allocation5 + $0x80] sm:$0xc0] }
 0x441   : > { %v976_v26 = vsel %vm975_vm15, %v2394_v34, %v2400_v37  ;;  %v977_v63 = vsel %vm975_vm15, %v2400_v37, %v2394_v34  ;;  %vm1242_vm15 = vcmp.lt.s32.totalorder %v2160_v21, 94 }
 0x442   : > { %v969_v37 = vadd.f32 %v967_v22, %v963_v56  ;;  %v970_v1 = vadd.f32 %v968_v12, %v964_v57  ;;  %v986_v25 = vmul.f32 %v982_v17, %v976_v26  ;;  %v987_v9 = vmul.f32 %v983_v46, %v977_v63  ;;  %v2572_v46 = vld [vmem:[#allocation5 + $0x80] sm:$0x30]  ;;  %v2588_v63 = vld [vmem:[#allocation5 + $0x88] sm:$0x30] }
 0x444   : > { %v2404_v39 = vpop.permute.xlu1 %992  ;;  %v2406_v40 = vpop.permute.xlu0 %1028  ;;  %v988_v56 = vadd.f32 %v986_v25, %v969_v37  ;;  %v989_v57 = vadd.f32 %v987_v9, %v970_v1  ;;  %v1142_v1 = vrot.slane %v2588_v63, 4 }
 0x445   : > { %v995_v34 = vsel %vm994_vm0, %v2398_v36, %v2404_v39  ;;  %v996_v59 = vsel %vm994_vm0, %v2404_v39, %v2398_v36  ;;  %v1090_v39 = vrot.slane %v2538_v33, 6  ;;  %vm1255_vm0 = vcmp.lt.s32.totalorder %v2160_v21, 93 }
 0x446   : > { %v1005_v35 = vmul.f32 %v1001_v28, %v995_v34  ;;  %v1006_v17 = vmul.f32 %v1002_v8, %v996_v59  ;;  %v1122_v28 = vrot.slane %v2556_v10, 2  ;;  %v1123_v8 = vrot.slane %v2558_v23, 2  ;;  %v2602_v34 = vld [vmem:[#allocation5 + $0x88] sm:$0xc0] }
 0x448   : > { %v2408_v41 = vpop.permute.xlu1 %1011  ;;  %v2410_v42 = vpop.permute.xlu0 %1041  ;;  %v1007_v22 = vadd.f32 %v1005_v35, %v988_v56  ;;  %v1008_v33 = vadd.f32 %v1006_v17, %v989_v57 }
 0x449   : > { %v1014_v45 = vsel %vm1013_vm1, %v2402_v38, %v2408_v41  ;;  %v1015_v36 = vsel %vm1013_vm1, %v2408_v41, %v2402_v38  ;;  %vm1274_vm1 = vcmp.lt.s32.totalorder %v2160_v21, 83 }
 0x44a   : > { %v1024_v58 = vmul.f32 %v1020_v29, %v1014_v45  ;;  %v1025_v26 = vmul.f32 %v1021_v31, %v1015_v36 }
 0x44c   : > { %v2412_v43 = vpop.permute.xlu1 %1030  ;;  %v2414_v44 = vpop.permute.xlu0 %1060  ;;  %v1026_v25 = vadd.f32 %v1024_v58, %v1007_v22  ;;  %v1027_v9 = vadd.f32 %v1025_v26, %v1008_v33  ;;  %v1105_v58 = vld [vmem:[#allocation5 + $0x80] sm:$0x3] }
 0x44d   : > { %v1033_v38 = vsel %vm1032_vm2, %v2406_v40, %v2412_v43  ;;  %v1034_v41 = vsel %vm1032_vm2, %v2412_v43, %v2406_v40  ;;  %v1141_v43 = vrot.slane %v2572_v46, 4  ;;  %vm1293_vm2 = vcmp.lt.s32.totalorder %v2160_v21, 82 }
 0x44e   : > { %v1037_v29 = vmul.f32 %v1035_v11, %v1033_v38  ;;  %v1038_v31 = vmul.f32 %v1036_v50, %v1034_v41  ;;  %v2630_v38 = vld [vmem:[#allocation5 + $0x90] sm:$0xc]  ;;  %v2632_v41 = vld [vmem:[#allocation5 + $0x98] sm:$0xc] }
 0x44f   : > { %v1193_v22 = vrot.slane %v2632_v41, 2 }
 0x450   : > { %v2417_v47 = vpop.permute.xlu1 %1043  ;;  %v2419_v48 = vpop.permute.xlu0 %1079  ;;  %v1039_v11 = vadd.f32 %v1037_v29, %v1026_v25  ;;  %v1040_v50 = vadd.f32 %v1038_v31, %v1027_v9  ;;  %v2660_v31 = vld [vmem:[#allocation5 + $0x98] sm:$0x30] }
 0x451   : > { %v1046_v12 = vsel %vm1045_vm3, %v2410_v42, %v2417_v47  ;;  %v1047_v40 = vsel %vm1045_vm3, %v2417_v47, %v2410_v42  ;;  %v1212_v10 = vrot.slane %v2660_v31, 4  ;;  %vm1312_vm3 = vcmp.lt.s32.totalorder %v2160_v21, 81 }
 0x452   : > { %v1056_v45 = vmul.f32 %v1052_v3, %v1046_v12  ;;  %v1057_v36 = vmul.f32 %v1053_v15, %v1047_v40  ;;  %v2648_v12 = vld [vmem:[#allocation5 + $0x90] sm:$0x30] }
 0x454   : > { %v2425_v61 = vpop.permute.xlu1 %1062  ;;  %v2427_v62 = vpop.permute.xlu0 %1098 }
 0x455   : > { %v1065_v42 = vsel %vm1064_vm5, %v2414_v44, %v2425_v61  ;;  %v1066_v47 = vsel %vm1064_vm5, %v2425_v61, %v2414_v44  ;;  %v1160_v44 = vrot.slane %v2600_v13, 6  ;;  %v1161_v61 = vrot.slane %v2602_v34, 6 }
 0x456   : > { %v1075_v3 = vmul.f32 %v1071_v30, %v1065_v42  ;;  %v1076_v15 = vmul.f32 %v1072_v60, %v1066_v47  ;;  %v1058_v30 = vadd.f32 %v1056_v45, %v1039_v11  ;;  %v1059_v60 = vadd.f32 %v1057_v36, %v1040_v50  ;;  %v2680_v36 = vld [vmem:[#allocation5 + $0x90] sm:$0xc0] }
 0x457   : > { %vm1325_vm5 = vcmp.lt.s32.totalorder %v2160_v21, 80 }
 0x458   : > { %v2435_v52 = vpop.permute.xlu1 %1081  ;;  %v2437_v49 = vpop.permute.xlu0 %1111  ;;  %v1077_v33 = vadd.f32 %v1075_v3, %v1058_v30  ;;  %v1078_v29 = vadd.f32 %v1076_v15, %v1059_v60  ;;  %v1175_v3 = vld [vmem:[#allocation5 + $0x90] sm:$0x3]  ;;  %v1176_v15 = vld [vmem:[#allocation5 + $0x98] sm:$0x3]  ;;  %v1277_v60 = vld [vmem:[#allocation5 + $0xa0] sm:$0x30] }
 0x459   : > { %v1084_v35 = vsel %vm1083_vm6, %v2419_v48, %v2435_v52  ;;  %v1085_v17 = vsel %vm1083_vm6, %v2435_v52, %v2419_v48  ;;  %v1106_v48 = vld [vmem:[#allocation5 + $0x88] sm:$0x3]  ;;  %vm1344_vm6 = vcmp.lt.s32.totalorder %v2160_v21, 79 }
 0x45a   : > { %v1094_v26 = vmul.f32 %v1090_v39, %v1084_v35  ;;  %v1095_v63 = vmul.f32 %v1091_v32, %v1085_v17  ;;  %v2682_v35 = vld [vmem:[#allocation5 + $0x98] sm:$0xc0] }
 0x45b   : > { %v1231_v46 = vrot.slane %v2682_v35, 6 }
 0x45c   : > { %v2455_v4 = vpop.permute.xlu1 %1100  ;;  %v2457_v7 = vpop.permute.xlu0 %1130  ;;  %v1096_v47 = vadd.f32 %v1094_v26, %v1077_v33  ;;  %v1097_v25 = vadd.f32 %v1095_v63, %v1078_v29 }
 0x45d   : > { %v1103_v52 = vsel %vm1102_vm7, %v2427_v62, %v2455_v4  ;;  %v1104_v54 = vsel %vm1102_vm7, %v2455_v4, %v2427_v62  ;;  %v1192_v4 = vrot.slane %v2630_v38, 2  ;;  %v1230_v38 = vrot.slane %v2680_v36, 6  ;;  %v1246_v36 = vld [vmem:[#allocation5 + $0xa8] sm:$0x3] }
 0x45e   : > { %v1107_v39 = vmul.f32 %v1105_v58, %v1103_v52  ;;  %v1108_v32 = vmul.f32 %v1106_v48, %v1104_v54  ;;  %v1258_v48 = vld [vmem:[#allocation5 + $0xa0] sm:$0xc]  ;;  %v1259_v52 = vld [vmem:[#allocation5 + $0xa8] sm:$0xc]  ;;  %vm1363_vm7 = vcmp.lt.s32.totalorder %v2160_v21, 78 }
 0x460   : > { %v2477_v6 = vpop.permute.xlu1 %1113  ;;  %v2479_v2 = vpop.permute.xlu0 %1149  ;;  %v1109_v23 = vadd.f32 %v1107_v39, %v1096_v47 }
 0x461   : > { %v1116_v40 = vsel %vm1115_vm8, %v2437_v49, %v2477_v6  ;;  %v1117_v62 = vsel %vm1115_vm8, %v2477_v6, %v2437_v49  ;;  %v1211_v6 = vrot.slane %v2648_v12, 4  ;;  %vm1382_vm8 = vcmp.lt.s32.totalorder %v2160_v21, 77 }
 0x462   : > { %v1126_v9 = vmul.f32 %v1122_v28, %v1116_v40  ;;  %v1127_v45 = vmul.f32 %v1123_v8, %v1117_v62  ;;  %v1110_v28 = vadd.f32 %v1108_v32, %v1097_v25  ;;  %v1263_v40 = vrot.slane %v1259_v52, 2  ;;  %v1278_v32 = vld [vmem:[#allocation5 + $0xa8] sm:$0x30] }
 0x464   : > { %v2497_v14 = vpop.permute.xlu1 %1132  ;;  %v2499_v27 = vpop.permute.xlu0 %1168 }
 0x465   : > { %v1135_v42 = vsel %vm1134_vm9, %v2457_v7, %v2497_v14  ;;  %v1136_v49 = vsel %vm1134_vm9, %v2497_v14, %v2457_v7 }
 0x466   : > { %v1145_v8 = vmul.f32 %v1141_v43, %v1135_v42  ;;  %v1146_v17 = vmul.f32 %v1142_v1, %v1136_v49  ;;  %v1128_v43 = vadd.f32 %v1126_v9, %v1109_v23  ;;  %v1129_v1 = vadd.f32 %v1127_v45, %v1110_v28  ;;  %v1245_v45 = vld [vmem:[#allocation5 + $0xa0] sm:$0x3] }
 0x468   : > { %v2511_v53 = vpop.permute.xlu1 %1151  ;;  %v2513_v20 = vpop.permute.xlu0 %1181  ;;  %v1148_v30 = vadd.f32 %v1146_v17, %v1129_v1  ;;  %v1329_v1 = vld [vmem:[#allocation5 + $0xb8] sm:$0xc] }
 0x469   : > { %v1154_v7 = vsel %vm1153_vm10, %v2479_v2, %v2511_v53  ;;  %v1155_v14 = vsel %vm1153_vm10, %v2511_v53, %v2479_v2 }
 0x46a   : > { %v1164_v41 = vmul.f32 %v1160_v44, %v1154_v7  ;;  %v1165_v58 = vmul.f32 %v1161_v61, %v1155_v14 }
 0x46c   : > { %v2542_v18 = vpop.permute.xlu1 %1170  ;;  %v2544_v55 = vpop.permute.xlu0 %1200  ;;  %v1167_v33 = vadd.f32 %v1165_v58, %v1148_v30 }
 0x46d   : > { %v1173_v2 = vsel %vm1172_vm11, %v2499_v27, %v2542_v18  ;;  %v1174_v53 = vsel %vm1172_vm11, %v2542_v18, %v2499_v27  ;;  %v1147_v18 = vadd.f32 %v1145_v8, %v1128_v43  ;;  %v1328_v43 = vld [vmem:[#allocation5 + $0xb0] sm:$0xc] }
 0x46e   : > { %v1177_v44 = vmul.f32 %v1175_v3, %v1173_v2  ;;  %v1178_v61 = vmul.f32 %v1176_v15, %v1174_v53 }
 0x46f   : > { %v1166_v62 = vadd.f32 %v1164_v41, %v1147_v18  ;;  %v1333_v18 = vrot.slane %v1329_v1, 2  ;;  %v1386_v1 = vld [vmem:[#allocation5 + $0xc8] sm:$0x3] }
 0x470   : > { %v2574_v5 = vpop.permute.xlu1 %1183  ;;  %v2576_v51 = vpop.permute.xlu0 %1219  ;;  %v1180_v49 = vadd.f32 %v1178_v61, %v1167_v33 }
 0x471   : > { %v1186_v54 = vsel %vm1185_vm12, %v2513_v20, %v2574_v5  ;;  %v1187_v27 = vsel %vm1185_vm12, %v2574_v5, %v2513_v20  ;;  %v1262_v5 = vrot.slane %v1258_v48, 2  ;;  %v1347_v48 = vld [vmem:[#allocation5 + $0xb0] sm:$0x30] }
 0x472   : > { %v1196_v29 = vmul.f32 %v1192_v4, %v1186_v54  ;;  %v1197_v39 = vmul.f32 %v1193_v22, %v1187_v27  ;;  %v1296_v4 = vld [vmem:[#allocation5 + $0xa0] sm:$0xc0]  ;;  %v1297_v22 = vld [vmem:[#allocation5 + $0xa8] sm:$0xc0]  ;;  %v1332_v27 = vrot.slane %v1328_v43, 2 }
 0x473   : > { %v1300_v17 = vrot.slane %v1296_v4, 6  ;;  %v1301_v3 = vrot.slane %v1297_v22, 6  ;;  %v1385_v43 = vld [vmem:[#allocation5 + $0xc0] sm:$0x3] }
 0x474   : > { %v2604_v59 = vpop.permute.xlu1 %1202  ;;  %v2606_v37 = vpop.permute.xlu0 %1238  ;;  %v1199_v7 = vadd.f32 %v1197_v39, %v1180_v49 }
 0x475   : > { %v1205_v12 = vsel %vm1204_vm13, %v2544_v55, %v2604_v59  ;;  %v1206_v20 = vsel %vm1204_vm13, %v2604_v59, %v2544_v55  ;;  %v1281_v55 = vrot.slane %v1277_v60, 4  ;;  %v1179_v59 = vadd.f32 %v1177_v44, %v1166_v62 }
 0x476   : > { %v1215_v47 = vmul.f32 %v1211_v6, %v1205_v12  ;;  %v1216_v25 = vmul.f32 %v1212_v10, %v1206_v20  ;;  %v1348_v12 = vld [vmem:[#allocation5 + $0xb8] sm:$0x30]  ;;  %v1315_v20 = vld [vmem:[#allocation5 + $0xb0] sm:$0x3] }
 0x477   : > { %v1198_v6 = vadd.f32 %v1196_v29, %v1179_v59  ;;  %v1352_v49 = vrot.slane %v1348_v12, 4 }
 0x478   : > { %v2634_v56 = vpop.permute.xlu1 %1221  ;;  %v2636_v57 = vpop.permute.xlu0 %1251 }
 0x479   : > { %v1224_v31 = vsel %vm1223_vm14, %v2576_v51, %v2634_v56  ;;  %v1225_v42 = vsel %vm1223_vm14, %v2634_v56, %v2576_v51  ;;  %v1282_v56 = vrot.slane %v1278_v32, 4  ;;  %v1217_v15 = vadd.f32 %v1215_v47, %v1198_v6 }
 0x47a   : > { %v1234_v14 = vmul.f32 %v1230_v38, %v1224_v31  ;;  %v1235_v10 = vmul.f32 %v1231_v46, %v1225_v42  ;;  %v1366_v31 = vld [vmem:[#allocation5 + $0xb0] sm:$0xc0]  ;;  %v1367_v42 = vld [vmem:[#allocation5 + $0xb8] sm:$0xc0] }
 0x47c   : > { %v2662_v13 = vpop.permute.xlu1 %1240  ;;  %v2664_v34 = vpop.permute.xlu0 %1270 }
 0x47d   : > { %v1243_v35 = vsel %vm1242_vm15, %v2606_v37, %v2662_v13  ;;  %v1244_v51 = vsel %vm1242_vm15, %v2662_v13, %v2606_v37  ;;  %v1218_v37 = vadd.f32 %v1216_v25, %v1199_v7 }
 0x47e   : > { %v1247_v13 = vmul.f32 %v1245_v45, %v1243_v35  ;;  %v1248_v2 = vmul.f32 %v1246_v36, %v1244_v51  ;;  %v1370_v36 = vrot.slane %v1366_v31, 6  ;;  %v1371_v35 = vrot.slane %v1367_v42, 6 }
 0x480   : > { %v1254_v11 = vpop.permute.xlu1 %1253  ;;  %v2696_v50 = vpop.permute.xlu0 %1289 }
 0x481   : > { %v1256_v28 = vsel %vm1255_vm0, %v2636_v57, %v1254_v11  ;;  %v1257_v8 = vsel %vm1255_vm0, %v1254_v11, %v2636_v57  ;;  %v1236_v57 = vadd.f32 %v1234_v14, %v1217_v15  ;;  %v1237_v11 = vadd.f32 %v1235_v10, %v1218_v37 }
 0x482   : > { %v1266_v41 = vmul.f32 %v1262_v5, %v1256_v28  ;;  %v1267_v58 = vmul.f32 %v1263_v40, %v1257_v8  ;;  %v1316_v5 = vld [vmem:[#allocation5 + $0xb8] sm:$0x3] }
 0x483   : > { %v1250_v30 = vadd.f32 %v1248_v2, %v1237_v11 }
 0x484   : > { %v1273_v26 = vpop.permute.xlu1 %1272  ;;  %v2718_v63 = vpop.permute.xlu0 %1308 }
 0x485   : > { %v1275_v38 = vsel %vm1274_vm1, %v2664_v34, %v1273_v26  ;;  %v1276_v46 = vsel %vm1274_vm1, %v1273_v26, %v2664_v34  ;;  %v1249_v34 = vadd.f32 %v1247_v13, %v1236_v57  ;;  %v1269_v29 = vadd.f32 %v1267_v58, %v1250_v30 }
 0x486   : > { %v1285_v44 = vmul.f32 %v1281_v55, %v1275_v38  ;;  %v1286_v61 = vmul.f32 %v1282_v56, %v1276_v46 }
 0x487   : > { %v1268_v33 = vadd.f32 %v1266_v41, %v1249_v34 }
 0x488   : > { %v1292_v9 = vpop.permute.xlu1 %1291  ;;  %v1322_v23 = vpop.permute.xlu0 %1321 }
 0x489   : > { %v1294_v52 = vsel %vm1293_vm2, %v2696_v50, %v1292_v9  ;;  %v1295_v54 = vsel %vm1293_vm2, %v1292_v9, %v2696_v50  ;;  %v1351_v50 = vrot.slane %v1347_v48, 4  ;;  %v1287_v47 = vadd.f32 %v1285_v44, %v1268_v33 }
 0x48a   : > { %v1304_v39 = vmul.f32 %v1300_v17, %v1294_v52  ;;  %v1305_v32 = vmul.f32 %v1301_v3, %v1295_v54 }
 0x48c   : > { %v1311_v53 = vpop.permute.xlu1 %1310  ;;  %v1341_v60 = vpop.permute.xlu0 %1340  ;;  %v1306_v51 = vadd.f32 %v1304_v39, %v1287_v47 }
 0x48d   : > { %v1313_v40 = vsel %vm1312_vm3, %v2718_v63, %v1311_v53  ;;  %v1314_v62 = vsel %vm1312_vm3, %v1311_v53, %v2718_v63  ;;  %v1288_v63 = vadd.f32 %v1286_v61, %v1269_v29 }
 0x48e   : > { %v1317_v25 = vmul.f32 %v1315_v20, %v1313_v40  ;;  %v1318_v4 = vmul.f32 %v1316_v5, %v1314_v62 }
 0x48f   : > { %v1307_v56 = vadd.f32 %v1305_v32, %v1288_v63 }
 0x490   : > { %v1324_v26 = vpop.permute.xlu1 %1323  ;;  %v1360_v14 = vpop.permute.xlu0 %1359  ;;  %v1319_v10 = vadd.f32 %v1317_v25, %v1306_v51  ;;  %v2898_v51 = vld [vmem:[#allocation14_spill] sm:$0xff] }
 0x491   : > { %v1326_v55 = vsel %vm1325_vm5, %v1322_v23, %v1324_v26  ;;  %v1327_v59 = vsel %vm1325_vm5, %v1324_v26, %v1322_v23  ;;  %v1320_v23 = vadd.f32 %v1318_v4, %v1307_v56  ;;  %v2899_v56 = vld [vmem:[#allocation13_spill] sm:$0xff] }
 0x492   : > { %v1336_v6 = vmul.f32 %v1332_v27, %v1326_v55  ;;  %v1337_v7 = vmul.f32 %v1333_v18, %v1327_v59 }
 0x494   : > { %v1343_v22 = vpop.permute.xlu1 %1342  ;;  %v1338_v37 = vadd.f32 %v1336_v6, %v1319_v10  ;;  %v1339_v13 = vadd.f32 %v1337_v7, %v1320_v23  ;;  %v1379_v57 = vpop.permute.xlu0 %1378  ;;  %v1741_v23 = vld [vmem:[%s2109_s29 + $0x30] sm:$0xff] }
 0x495   : > { %v1345_v9 = vsel %vm1344_vm6, %v1341_v60, %v1343_v22  ;;  %v1346_v45 = vsel %vm1344_vm6, %v1343_v22, %v1341_v60 }
 0x496   : > { %v1355_v28 = vmul.f32 %v1351_v50, %v1345_v9  ;;  %v1356_v8 = vmul.f32 %v1352_v49, %v1346_v45  ;;  %v2896_v9 = vld [vmem:[#allocation12_spill] sm:$0xff] }
 0x498   : > { %v1362_v17 = vpop.permute.xlu1 %1361  ;;  %v1357_v38 = vadd.f32 %v1355_v28, %v1338_v37  ;;  %v1358_v46 = vadd.f32 %v1356_v8, %v1339_v13  ;;  %v1742_v8 = vld [vmem:[%s2109_s29 + $0x8] sm:$0xff] }
 0x499   : > { %v1364_v3 = vsel %vm1363_vm7, %v1360_v14, %v1362_v17  ;;  %v1365_v15 = vsel %vm1363_vm7, %v1362_v17, %v1360_v14  ;;  %v1740_v14 = vld [vmem:[%s2109_s29 + $0x20] sm:$0xff]  ;;  %v1744_v37 = vld [vmem:[%s2109_s29 + $0x28] sm:$0xff] }
 0x49a   : > { %v1374_v2 = vmul.f32 %v1370_v36, %v1364_v3  ;;  %v1375_v53 = vmul.f32 %v1371_v35, %v1365_v15  ;;  %v2897_v36 = vld [vmem:[#allocation11_spill] sm:$0xff]  ;;  %v1743_v3 = vld [vmem:[%s2109_s29 + $0x18] sm:$0xff] }
 0x49c   : > { %v1381_v11 = vpop.permute.xlu1 %1380  ;;  %v1376_v48 = vadd.f32 %v1374_v2, %v1357_v38  ;;  %v1377_v52 = vadd.f32 %v1375_v53, %v1358_v46  ;;  %v1745_v2 = vld [vmem:[%s2109_s29 + $0x38] sm:$0xff] }
 0x49d   : > { %v1383_v41 = vsel %vm1382_vm8, %v1379_v57, %v1381_v11  ;;  %v1384_v58 = vsel %vm1382_vm8, %v1381_v11, %v1379_v57 }
 0x49e   : > { %v1387_v54 = vmul.f32 %v1385_v43, %v1383_v41  ;;  %v1388_v27 = vmul.f32 %v1386_v1, %v1384_v58 }
 0x4a0   : > { %v1389_v18 = vadd.f32 %v1387_v54, %v1376_v48  ;;  %v1390_v34 = vadd.f32 %v1388_v27, %v1377_v52 }
 0x4a2   : > { %v1391_v21 = vsel %vm368_vm4, %v1389_v18, 0.0  ;;  %v1398_v30 = vsel %vm368_vm4, %v1390_v34, 0.0 }
 0x4a3   : > { %v1392_v44 = vrot.slane %v1391_v21, 4  ;;  %v1399_v61 = vrot.slane %v1398_v30, 4 }
 0x4a5   : > { %v1393_v60 = vadd.f32 %v1392_v44, %v1391_v21  ;;  %v1400_v26 = vadd.f32 %v1399_v61, %v1398_v30 }
 0x4a7   : > { %v1394_v12 = vrot.slane %v1393_v60, 2  ;;  %v1401_v20 = vrot.slane %v1400_v26, 2 }
 0x4a9   : > { %v1395_v5 = vadd.f32 %v1394_v12, %v1393_v60  ;;  %v1402_v40 = vadd.f32 %v1401_v20, %v1400_v26 }
 0x4ab   : > { %v1396_v62 = vrot.slane %v1395_v5, 1  ;;  %v1403_v50 = vrot.slane %v1402_v40, 1 }
 0x4ad   : > { %v1397_v33 = vadd.f32 %v1396_v62, %v1395_v5  ;;  %v1404_v29 = vadd.f32 %v1403_v50, %v1402_v40 }
 0x4af   : > { %v1559_v39 = vmul.f32 -1.442695, %v1397_v33  ;;  %v1560_v32 = vmul.f32 -1.442695, %v1404_v29 }
 0x4b1   : > { %1730 = vpow2.f32 %v1559_v39 }
 0x4b2   : > { %1732 = vpow2.f32 %v1560_v32 }
 0x4bb   : > { %v1731_v31 = vpop.eup %1730 }
 0x4bc   : > { %v1733_v42 = vpop.eup %1732  ;;  %v1411_v55 = vadd.f32 1.0, %v1731_v31 }
 0x4bd   : > { %v1412_v59 = vadd.f32 1.0, %v1733_v42 }
 0x4be   : > { %1734 = vrcp.f32 %v1411_v55 }
 0x4bf   : > { %1736 = vrcp.f32 %v1412_v59 }
 0x4c8   : > { %v1735_v49 = vpop.eup %1734 }
 0x4c9   : > { %v1737_v47 = vpop.eup %1736  ;;  %v1417_v63 = vmul.f32 %v1735_v49, %v2195_v19  ;;  %v1419_v25 = vmul.f32 %v1735_v49, %v2189_v16  ;;  %v1421_v4 = vmul.f32 %v1735_v49, %v2211_v0  ;;  %v1423_v22 = vmul.f32 %v1735_v49, %v2201_v24  ;;  %v1738_v0 = vld [vmem:[%s2109_s29] sm:$0xff]  ;;  %v1739_v24 = vld [vmem:[%s2109_s29 + $0x10] sm:$0xff]  ;;  %s1931_s29 = smov [#allocation7]  }
 0x4ca   : > { %v1418_v45 = vmul.f32 %v1737_v47, %v2896_v9  ;;  %v1420_v35 = vmul.f32 %v1737_v47, %v2897_v36  ;;  %v1422_v19 = vmul.f32 %v1737_v47, %v2898_v51  ;;  %v1424_v16 = vmul.f32 %v1737_v47, %v2899_v56  ;;  %s1808_s8 = sshll.u32 %s1931_s29, 4  ;;  %s1809_s8 = int_to_ptr.vmem [resolvable:$false] %s1808_s8 }
 0x4cb   : > { %v1425_v6 = vadd.f32 %v1738_v0, %v1417_v63  ;;  %v1427_v7 = vadd.f32 %v1739_v24, %v1419_v25  ;;  %v1429_v10 = vadd.f32 %v1740_v14, %v1421_v4  ;;  %v1431_v28 = vadd.f32 %v1741_v23, %v1423_v22  ;;  %s1810_s25 = scalar_lea.vmem %s1809_s8, 2048  ;;  %p1811_p10 = scmp.lt.s32.totalorder %s2816_s10, %s1809_s8 }
 0x4cc   : > { %v1426_v17 = vadd.f32 %v1742_v8, %v1418_v45  ;;  %v1428_v15 = vadd.f32 %v1743_v3, %v1420_v35  ;;  %v1430_v13 = vadd.f32 %v1744_v37, %v1422_v19  ;;  %v1432_v53 = vadd.f32 %v1745_v2, %v1424_v16  ;;  %p1812_p13 = scmp.lt.s32.totalorder %s1810_s25, %s1804_s26 }
 0x4cd   : > { %1433 = vst [vmem:[%s2796_s28] sm:$0xff] %v1425_v6  ;;  %1435 = vst [vmem:[%s2796_s28 + $0x10] sm:$0xff] %v1427_v7 }
 0x4ce   : > { %1437 = vst [vmem:[%s2796_s28 + $0x20] sm:$0xff] %v1429_v10  ;;  %1439 = vst [vmem:[%s2796_s28 + $0x30] sm:$0xff] %v1431_v28  ;;  %p1813_p3 = por %p1812_p13, %p1811_p10 }
 0x4cf   : > { %1434 = vst [vmem:[%s2796_s28 + $0x8] sm:$0xff] %v1426_v17  ;;  %1436 = vst [vmem:[%s2796_s28 + $0x18] sm:$0xff] %v1428_v15 }
 0x4d0   : > { %1438 = vst [vmem:[%s2796_s28 + $0x28] sm:$0xff] %v1430_v13  ;;  %1440 = vst [vmem:[%s2796_s28 + $0x38] sm:$0xff] %v1432_v53  ;;  %p1814_p7 = pnand %p1813_p3, %p1807_p8 }
 0x4d2   : > { %1817 = shalt.err (!%p1814_p7)
}
 0x4d3   : > { %s1818_s14 = scalar_lea.hbm %s2810_s6, 1024  ;;  %s1822_s12 = scalar_lea.hbm %s2873_s4, 2048 }
 0x4d4   : > { %p1819_p9 = scmp.ne.s32.totalorder %s2810_s6, %s1818_s14  ;;  %p1823_p5 = scmp.lt.u32.totalorder %s2810_s6, %s2873_s4 }
 0x4d5   : > { %p1824_p11 = scmp.lt.u32.totalorder %s1822_s12, %s1818_s14  ;;  %p1826_p4 = scmp.lt.u32.totalorder %s1818_s14, %s2810_s6 }
 0x4d6   : > { %p1820_p1 = pnand %p1819_p9, %p2052_p12 }
 0x4d7   : > { %p1825_p2 = por %p1824_p11, %p1823_p5 }
 0x4d8   : > { %p1821_p0 = pneg %p1820_p1 }
 0x4d9   : > { %p1827_p6 = por %p1826_p4, %p1825_p2 }
 0x4db   : > { %p1828_p8 = pnand %p1827_p6, %p1821_p0 }
 0x4dd   : > { %1831 = shalt.err (!%p1828_p8)
}
 0x4de   : > { %s1932_s28 = smov 256  }
 0x4df   : > { %1609 = dma.vmem_to_hbm [thread:$0]  (%p2052_p12), %s2816_s10, 1024, %s2810_s6, %s1442_s7, %s1932_s28, %s1932_s28, %s1900_s5  }
 0x4e0 PF: > { %s1470_s19 = sand.u32 1, %s1862_s15   ;;  %p2900_p10 = scmp.ne.s32.totalorder %s2882_s22, 0 }
 0x4e1   : > { %p2901_p13 = scmp.ge.s32.totalorder %s1874_s18, 2  ;;  %s1471_s20 = scalar_lea.sflag [#allocation4], %s1470_s19 }
 0x4e3   : > { %p1620_p3 = pnand %p2901_p13, %p2900_p10 }
 0x4e5   : > { %1857 = dma.done.wait (!%p1620_p3), %s1471_s20, 1024  }
 0x4e6   : > { %1859 = vsyncadd (!%p1620_p3), %s1471_s20, 4294966272  ;;  %p18_p7 = scmp.ge.s32.totalorder %s2014_s27, 4   ;;  %s2902_s15 = smov %s1866_s16 }
 0x4e7   : > { %s2903_s16 = smov %s1870_s17  ;;  %s2904_s17 = smov %s2048_s24 }
 0x4e8   : > { %s2905_s18 = smov %s2014_s27  ;;  %20 = sbr.rel (!%p18_p7) target bundleno = 6 (0x6), region = 85 }
 0x4ef   :  { %1476 = vsyncpa [#allocation3], 1 }
 0x4f0   :  { %1478 = vsyncpa [#allocation3 + $0x1], 1 }
 0x4f1   :  { %1479 = vsyncpa [#allocation6], 1 }
 0x4f2   :  { %1480 = vsyncpa [#allocation4], 1 }
 0x4f3   :  { %1482 = vsyncpa [#allocation4 + $0x1], 1 }

</bundles_post_ra>
